<compile_context>
chip_gen: v7x
topology: tpu7x:2x2x1
jax: 0.10.0
libtpu: 0.0.40
codegen_flags: <defaults>
</compile_context>

<pallas_src>
import jax
import jax.numpy as jnp
from jax.experimental import pallas as pl
from jax.experimental.pallas import tpu as pltpu

HIDDEN_DIM = 150
LATENT_DIM = 300
NUM_CLASSES = 10
IMG_DIM = 28 * 28            # 784 (multiple of 8 -> fine as a K / input dim)

# 128-lane padded sizes (output / N dims only)
HID_PAD = 256                # 150 -> 256
LAT_PAD = 384                # 300 -> 384
IMG_PAD = 896                # 784 -> 896 (recon store stays lane-dense)
ML_PAD = 2 * LAT_PAD         # fused mu|logvar head width = 768
NC_PAD = 16                  # class-embedding table rows padded 10 -> 16


def _round_up(x, m):
    return (x + m - 1) // m * m


def _cdiv(a, b):
    return (a + b - 1) // b


def _choose_tile(B, tb_max=512):
    """Waste-aware batch tile; >=2 grid steps when possible (v7x megacore)."""
    n_steps = _cdiv(B, tb_max)
    if n_steps == 1 and B >= 16:
        n_steps = 2
    tb = _round_up(_cdiv(B, n_steps), 8)
    return tb, tb * n_steps


def _sigmoid(x):
    # exp goes to the EUP; approx reciprocal is a near-free EUP op as well.
    return pl.reciprocal(1.0 + jnp.exp(-x), approx=True)


def _vae_kernel(
    x_ref,        # [TB, 784]  f32
    eps_ref,      # [TB, LAT_PAD] f32 (noise, zero in pad cols)
    y_ref,        # [TB, 1]    i32 labels
    emb_ref,      # [NC_PAD, LAT_PAD] f32 class-embedding table (VMEM-resident)
    w_enc_ref,    # [784, HID_PAD]   bf16
    b_enc_ref,    # [1, HID_PAD]     f32
    w_ml_ref,     # [HID_PAD, ML_PAD] bf16  fused mu|logvar weights
    b_ml_ref,     # [1, ML_PAD]      f32
    w_d1_ref,     # [LAT_PAD, HID_PAD] bf16
    b_d1_ref,     # [1, HID_PAD]     f32
    w_d2_ref,     # [HID_PAD, IMG_PAD] bf16
    b_d2_ref,     # [1, IMG_PAD]     f32
    recon_ref,    # [TB, IMG_PAD] f32 out
    mu_ref,       # [TB, LAT_PAD] f32 out
    logvar_ref,   # [TB, LAT_PAD] f32 out
):
    bf16 = jnp.bfloat16
    f32 = jnp.float32

    # encoder + ReLU  (bf16 operands, f32 accumulate)
    x = x_ref[...].astype(bf16)
    x1 = jnp.dot(x, w_enc_ref[...], preferred_element_type=f32) + b_enc_ref[...]
    x1 = jnp.maximum(x1, 0.0)

    # fused mu|logvar head: sigmoid(relu(linear(x1)))
    ml = jnp.dot(x1.astype(bf16), w_ml_ref[...],
                 preferred_element_type=f32) + b_ml_ref[...]
    ml = _sigmoid(jnp.maximum(ml, 0.0))
    mu = ml[:, :LAT_PAD]
    lv = ml[:, LAT_PAD:]

    # reparameterize: x2 = mu + eps * exp(logvar / 2)
    x2 = mu + eps_ref[...] * jnp.exp(lv * 0.5)

    # class-embedding gather inside the kernel: one-hot [TB,16] x [16,384].
    tb = y_ref.shape[0]
    cls = jax.lax.broadcasted_iota(jnp.int32, (tb, NC_PAD), 1)
    onehot = (y_ref[...] == cls).astype(f32)
    emb = jnp.dot(onehot, emb_ref[...], preferred_element_type=f32)

    h = emb + x2

    # decoder: Linear -> ReLU -> Linear -> Sigmoid
    d1 = jnp.dot(h.astype(bf16), w_d1_ref[...],
                 preferred_element_type=f32) + b_d1_ref[...]
    d1 = jnp.maximum(d1, 0.0)
    d2 = jnp.dot(d1.astype(bf16), w_d2_ref[...],
                 preferred_element_type=f32) + b_d2_ref[...]

    recon_ref[...] = _sigmoid(d2)
    # NOTE: sigmoid(0)=0.5 values in mu/lv pad columns are neutralized by the
    # zero rows of the padded w_d1 and sliced off before returning.
    mu_ref[...] = mu
    logvar_ref[...] = lv


def init_params(key):
    """Deterministic parameter init (PyTorch-style uniform +-1/sqrt(fan_in))."""
    ks = jax.random.split(key, 11)

    def lin(kw, kb, fan_in, fan_out):
        bound = 1.0 / jnp.sqrt(fan_in)
        w = jax.random.uniform(kw, (fan_in, fan_out), jnp.float32, -bound, bound)
        b = jax.random.uniform(kb, (1, fan_out), jnp.float32, -bound, bound)
        return w, b

    w_enc, b_enc = lin(ks[0], ks[1], IMG_DIM, HIDDEN_DIM)
    w_mu, b_mu = lin(ks[2], ks[3], HIDDEN_DIM, LATENT_DIM)
    w_lv, b_lv = lin(ks[4], ks[5], HIDDEN_DIM, LATENT_DIM)
    emb = jax.random.normal(ks[6], (NUM_CLASSES, LATENT_DIM), jnp.float32)
    w_d1, b_d1 = lin(ks[7], ks[8], LATENT_DIM, HIDDEN_DIM)
    w_d2, b_d2 = lin(ks[9], ks[10], HIDDEN_DIM, IMG_DIM)
    return dict(w_enc=w_enc, b_enc=b_enc, w_mu=w_mu, b_mu=b_mu,
                w_lv=w_lv, b_lv=b_lv, emb=emb,
                w_d1=w_d1, b_d1=b_d1, w_d2=w_d2, b_d2=b_d2)


def _pad2(a, rows, cols):
    return jnp.pad(a, ((0, rows - a.shape[0]), (0, cols - a.shape[1])))


def pack_params(params):
    """One-time pack: zero-pad to lane-aligned shapes, cast weights to bf16.

    Call once and cache the result; do NOT call per forward pass.
    """
    bf16 = jnp.bfloat16
    w_enc = _pad2(params["w_enc"], IMG_DIM, HID_PAD).astype(bf16)   # no row pad
    b_enc = _pad2(params["b_enc"], 1, HID_PAD)

    # fused mu|logvar head: [HID_PAD, 2*LAT_PAD], split at 384 (128-aligned)
    w_ml = jnp.zeros((HID_PAD, ML_PAD), jnp.float32)
    w_ml = w_ml.at[:HIDDEN_DIM, :LATENT_DIM].set(params["w_mu"])
    w_ml = w_ml.at[:HIDDEN_DIM, LAT_PAD:LAT_PAD + LATENT_DIM].set(params["w_lv"])
    b_ml = jnp.zeros((1, ML_PAD), jnp.float32)
    b_ml = b_ml.at[:, :LATENT_DIM].set(params["b_mu"])
    b_ml = b_ml.at[:, LAT_PAD:LAT_PAD + LATENT_DIM].set(params["b_lv"])

    emb = _pad2(params["emb"], NC_PAD, LAT_PAD)                      # keep f32

    # zero rows in the padded latent region of w_d1 kill the sigmoid(0)=0.5
    # values that live in mu/logvar pad columns.
    w_d1 = _pad2(params["w_d1"], LAT_PAD, HID_PAD).astype(bf16)
    b_d1 = _pad2(params["b_d1"], 1, HID_PAD)
    w_d2 = _pad2(params["w_d2"], HID_PAD, IMG_PAD).astype(bf16)
    b_d2 = _pad2(params["b_d2"], 1, IMG_PAD)
    return dict(w_enc=w_enc, b_enc=b_enc, w_ml=w_ml.astype(bf16), b_ml=b_ml,
                emb=emb, w_d1=w_d1, b_d1=b_d1, w_d2=w_d2, b_d2=b_d2)


@jax.jit
def vae_forward(packed, x, y, eps):
    """packed: pack_params(params); x: [B,1,28,28] f32; y: [B] int; eps: [B,300] f32."""
    B = x.shape[0]
    TB, B_pad = _choose_tile(B)
    grid = (B_pad // TB,)

    # Activations: flatten, pad batch rows only (x keeps its 784 columns).
    x_p = jnp.pad(x.reshape(B, IMG_DIM), ((0, B_pad - B), (0, 0)))
    eps_p = _pad2(eps, B_pad, LAT_PAD)
    y_p = jnp.pad(y.astype(jnp.int32).reshape(B, 1), ((0, B_pad - B), (0, 0)))

    def row_spec(cols):
        return pl.BlockSpec((TB, cols), lambda i: (i, 0))

    def const_spec(shape):
        # Constant index_map: never re-fetched -> single buffer is enough.
        return pl.BlockSpec(shape, lambda i: (0,) * len(shape),
                            pipeline_mode=pl.Buffered(buffer_count=1))

    n_weight_bytes = 2 * (IMG_DIM * HID_PAD + HID_PAD * ML_PAD
                          + LAT_PAD * HID_PAD + HID_PAD * IMG_PAD) \
        + 4 * (HID_PAD + ML_PAD + HID_PAD + IMG_PAD + NC_PAD * LAT_PAD)
    flops_per_row = 2 * (IMG_DIM * HID_PAD + HID_PAD * ML_PAD
                         + NC_PAD * LAT_PAD + LAT_PAD * HID_PAD
                         + HID_PAD * IMG_PAD)
    trans_per_row = 2 * (ML_PAD + IMG_PAD) + LAT_PAD     # exp + rcp sigmoids, exp(lv/2)
    bytes_per_row = 4 * (IMG_DIM + LAT_PAD + 1 + IMG_PAD + 2 * LAT_PAD)
    cost = pl.CostEstimate(
        flops=B_pad * flops_per_row,
        transcendentals=B_pad * trans_per_row,
        bytes_accessed=B_pad * bytes_per_row + n_weight_bytes,
    )

    recon_pad, mu_pad, lv_pad = pl.pallas_call(
        _vae_kernel,
        grid=grid,
        out_shape=(
            jax.ShapeDtypeStruct((B_pad, IMG_PAD), jnp.float32),
            jax.ShapeDtypeStruct((B_pad, LAT_PAD), jnp.float32),
            jax.ShapeDtypeStruct((B_pad, LAT_PAD), jnp.float32),
        ),
        in_specs=[
            row_spec(IMG_DIM),                  # x      [TB, 784]
            row_spec(LAT_PAD),                  # eps
            row_spec(1),                        # labels
            const_spec((NC_PAD, LAT_PAD)),      # class-embedding table
            const_spec((IMG_DIM, HID_PAD)),     # w_enc (bf16)
            const_spec((1, HID_PAD)),           # b_enc
            const_spec((HID_PAD, ML_PAD)),      # w_ml  (bf16, fused mu|logvar)
            const_spec((1, ML_PAD)),            # b_ml
            const_spec((LAT_PAD, HID_PAD)),     # w_d1  (bf16)
            const_spec((1, HID_PAD)),           # b_d1
            const_spec((HID_PAD, IMG_PAD)),     # w_d2  (bf16)
            const_spec((1, IMG_PAD)),           # b_d2
        ],
        out_specs=(
            row_spec(IMG_PAD),
            row_spec(LAT_PAD),
            row_spec(LAT_PAD),
        ),
        compiler_params=pltpu.CompilerParams(
            dimension_semantics=("parallel",),
            vmem_limit_bytes=32 * 1024 * 1024,
        ),
        cost_estimate=cost,
    )(
        x_p, eps_p, y_p,
        packed["emb"],
        packed["w_enc"], packed["b_enc"],
        packed["w_ml"], packed["b_ml"],
        packed["w_d1"], packed["b_d1"],
        packed["w_d2"], packed["b_d2"],
    )

    # Slice away batch + feature padding, then reshape to NCHW.
    # TODO(synk): downstream losses could consume the padded outputs directly
    # and skip this slice copy (pure overhead on a mem-bound kernel).
    reconstructed = recon_pad[:B, :IMG_DIM].reshape(B, 1, 28, 28)
    mu = mu_pad[:B, :LATENT_DIM]
    logvar = lv_pad[:B, :LATENT_DIM]
    return reconstructed, mu, logvar


def _reference_forward(params, x, y, eps):
    """Pure-JAX f32 reference mirroring the PyTorch forward."""
    B = x.shape[0]
    xf = x.reshape(B, IMG_DIM)
    x1 = jax.nn.relu(xf @ params["w_enc"] + params["b_enc"])
    mu = jax.nn.sigmoid(jax.nn.relu(x1 @ params["w_mu"] + params["b_mu"]))
    lv = jax.nn.sigmoid(jax.nn.relu(x1 @ params["w_lv"] + params["b_lv"]))
    x2 = mu + eps * jnp.exp(lv / 2.0)
    emb = params["emb"][y] + x2
    d1 = jax.nn.relu(emb @ params["w_d1"] + params["b_d1"])
    rec = jax.nn.sigmoid(d1 @ params["w_d2"] + params["b_d2"])
    return rec.reshape(B, 1, 28, 28), mu, lv


if __name__ == "__main__":
    key = jax.random.PRNGKey(0)
    k_param, k_x, k_y, k_eps = jax.random.split(key, 4)

    B = 2
    params = init_params(k_param)
    packed = pack_params(params)        # one-time pack (bf16 weights, padding)

    x = jax.random.uniform(k_x, (B, 1, 28, 28), jnp.float32)         # image batch
    y = jax.random.randint(k_y, (B,), 0, NUM_CLASSES, jnp.int32)     # labels
    eps = jax.random.normal(k_eps, (B, LATENT_DIM), jnp.float32)     # torch.randn equiv

    recon, mu, logvar = vae_forward(packed, x, y, eps)
    jax.block_until_ready((recon, mu, logvar))

    # Cross-check against the f32 pure-JAX reference (bf16 weights => relaxed tol).
    r_ref, mu_ref, lv_ref = _reference_forward(params, x, y, eps)
    assert recon.shape == (B, 1, 28, 28) and mu.shape == (B, LATENT_DIM)
    assert jnp.allclose(recon, r_ref, atol=2e-2)
    assert jnp.allclose(mu, mu_ref, atol=2e-2)
    assert jnp.allclose(logvar, lv_ref, atol=2e-2)

    print("KERNEL_OK")
</pallas_src>

<mosaic_0001>
module attributes {stable_mosaic.version = 11 : i64} {
  func.func @_vae_kernel(%arg0: i32, %arg1: memref<8x784xf32, #tpu.memory_space<vmem>>, %arg2: memref<8x384xf32, #tpu.memory_space<vmem>>, %arg3: memref<8x1xi32, #tpu.memory_space<vmem>>, %arg4: memref<16x384xf32, #tpu.memory_space<vmem>>, %arg5: memref<784x256xbf16, #tpu.memory_space<vmem>>, %arg6: memref<1x256xf32, #tpu.memory_space<vmem>>, %arg7: memref<256x768xbf16, #tpu.memory_space<vmem>>, %arg8: memref<1x768xf32, #tpu.memory_space<vmem>>, %arg9: memref<384x256xbf16, #tpu.memory_space<vmem>>, %arg10: memref<1x256xf32, #tpu.memory_space<vmem>>, %arg11: memref<256x896xbf16, #tpu.memory_space<vmem>>, %arg12: memref<1x896xf32, #tpu.memory_space<vmem>>, %arg13: memref<8x896xf32, #tpu.memory_space<vmem>>, %arg14: memref<8x384xf32, #tpu.memory_space<vmem>>, %arg15: memref<8x384xf32, #tpu.memory_space<vmem>>) attributes {dimension_semantics = [#tpu.dimension_semantics<parallel>], iteration_bounds = array<i64: 1>, scalar_prefetch = 0 : i64, scratch_operands = 0 : i64, tpu.core_type = #tpu.core_type<tc>, window_params = [{transform_indices = @transform_0, window_bounds = array<i64: 8, 784>}, {transform_indices = @transform_1, window_bounds = array<i64: 8, 384>}, {transform_indices = @transform_2, window_bounds = array<i64: 8, 1>}, {pipeline_mode = #tpu.pipeline_mode<synchronous>, transform_indices = @transform_3, window_bounds = array<i64: 16, 384>}, {pipeline_mode = #tpu.pipeline_mode<synchronous>, transform_indices = @transform_4, window_bounds = array<i64: 784, 256>}, {pipeline_mode = #tpu.pipeline_mode<synchronous>, transform_indices = @transform_5, window_bounds = array<i64: 1, 256>}, {pipeline_mode = #tpu.pipeline_mode<synchronous>, transform_indices = @transform_6, window_bounds = array<i64: 256, 768>}, {pipeline_mode = #tpu.pipeline_mode<synchronous>, transform_indices = @transform_7, window_bounds = array<i64: 1, 768>}, {pipeline_mode = #tpu.pipeline_mode<synchronous>, transform_indices = @transform_8, window_bounds = array<i64: 384, 256>}, {pipeline_mode = #tpu.pipeline_mode<synchronous>, transform_indices = @transform_9, window_bounds = array<i64: 1, 256>}, {pipeline_mode = #tpu.pipeline_mode<synchronous>, transform_indices = @transform_10, window_bounds = array<i64: 256, 896>}, {pipeline_mode = #tpu.pipeline_mode<synchronous>, transform_indices = @transform_11, window_bounds = array<i64: 1, 896>}, {transform_indices = @transform_12, window_bounds = array<i64: 8, 896>}, {transform_indices = @transform_13, window_bounds = array<i64: 8, 384>}, {transform_indices = @transform_14, window_bounds = array<i64: 8, 384>}]} {
    %c0 = arith.constant 0 : index
    %c0_0 = arith.constant 0 : index
    %0 = vector.load %arg1[%c0, %c0_0] : memref<8x784xf32, #tpu.memory_space<vmem>>, vector<8x784xf32>
    %1 = arith.truncf %0 : vector<8x784xf32> to vector<8x784xbf16>
    %c0_1 = arith.constant 0 : index
    %c0_2 = arith.constant 0 : index
    %2 = vector.load %arg5[%c0_1, %c0_2] : memref<784x256xbf16, #tpu.memory_space<vmem>>, vector<784x256xbf16>
    %cst = arith.constant dense<0.000000e+00> : vector<8x256xf32>
    %3 = tpu.matmul %1, %2, %cst {dimension_numbers = #tpu.dot_dimension_numbers<[1], [0], [0], [1], [0, 0, 1, 1], [], []>} : vector<8x784xbf16>, vector<784x256xbf16>, vector<8x256xf32> -> vector<8x256xf32>
    %c0_3 = arith.constant 0 : index
    %c0_4 = arith.constant 0 : index
    %4 = vector.load %arg6[%c0_3, %c0_4] : memref<1x256xf32, #tpu.memory_space<vmem>>, vector<1x256xf32>
    %5 = vector.broadcast %4 : vector<1x256xf32> to vector<8x256xf32>
    %6 = arith.addf %3, %5 : vector<8x256xf32>
    %cst_5 = arith.constant 0.000000e+00 : f32
    %7 = vector.broadcast %cst_5 : f32 to vector<8x256xf32>
    %8 = arith.maximumf %6, %7 : vector<8x256xf32>
    %9 = arith.truncf %8 : vector<8x256xf32> to vector<8x256xbf16>
    %c0_6 = arith.constant 0 : index
    %c0_7 = arith.constant 0 : index
    %10 = vector.load %arg7[%c0_6, %c0_7] : memref<256x768xbf16, #tpu.memory_space<vmem>>, vector<256x768xbf16>
    %cst_8 = arith.constant dense<0.000000e+00> : vector<8x768xf32>
    %11 = tpu.matmul %9, %10, %cst_8 {dimension_numbers = #tpu.dot_dimension_numbers<[1], [0], [0], [1], [0, 0, 1, 1], [], []>} : vector<8x256xbf16>, vector<256x768xbf16>, vector<8x768xf32> -> vector<8x768xf32>
    %c0_9 = arith.constant 0 : index
    %c0_10 = arith.constant 0 : index
    %12 = vector.load %arg8[%c0_9, %c0_10] : memref<1x768xf32, #tpu.memory_space<vmem>>, vector<1x768xf32>
    %13 = vector.broadcast %12 : vector<1x768xf32> to vector<8x768xf32>
    %14 = arith.addf %11, %13 : vector<8x768xf32>
    %cst_11 = arith.constant 0.000000e+00 : f32
    %15 = vector.broadcast %cst_11 : f32 to vector<8x768xf32>
    %16 = arith.maximumf %14, %15 : vector<8x768xf32>
    %cst_12 = arith.constant 0.000000e+00 : f32
    %17 = vector.broadcast %cst_12 : f32 to vector<8x768xf32>
    %18 = arith.subf %17, %16 : vector<8x768xf32>
    %19 = math.exp %18 : vector<8x768xf32>
    %cst_13 = arith.constant 1.000000e+00 : f32
    %20 = vector.broadcast %cst_13 : f32 to vector<8x768xf32>
    %21 = arith.addf %20, %19 : vector<8x768xf32>
    %22 = tpu.reciprocal %21 {approx = true} : vector<8x768xf32> -> vector<8x768xf32>
    %23 = vector.extract_strided_slice %22 {offsets = [0, 0], sizes = [8, 384], strides = [1, 1]} : vector<8x768xf32> to vector<8x384xf32>
    %24 = vector.extract_strided_slice %22 {offsets = [0, 384], sizes = [8, 384], strides = [1, 1]} : vector<8x768xf32> to vector<8x384xf32>
    %c0_14 = arith.constant 0 : index
    %c0_15 = arith.constant 0 : index
    %25 = vector.load %arg2[%c0_14, %c0_15] : memref<8x384xf32, #tpu.memory_space<vmem>>, vector<8x384xf32>
    %cst_16 = arith.constant 5.000000e-01 : f32
    %26 = vector.broadcast %cst_16 : f32 to vector<8x384xf32>
    %27 = arith.mulf %24, %26 : vector<8x384xf32>
    %28 = math.exp %27 : vector<8x384xf32>
    %29 = arith.mulf %25, %28 : vector<8x384xf32>
    %30 = arith.addf %23, %29 : vector<8x384xf32>
    %31 = tpu.iota {dimensions = array<i32: 1>} : vector<8x16xi32>
    %c0_17 = arith.constant 0 : index
    %c0_18 = arith.constant 0 : index
    %32 = vector.load %arg3[%c0_17, %c0_18] : memref<8x1xi32, #tpu.memory_space<vmem>>, vector<8x1xi32>
    %33 = vector.broadcast %32 : vector<8x1xi32> to vector<8x16xi32>
    %34 = arith.cmpi eq, %33, %31 : vector<8x16xi32>
    %35 = arith.extui %34 : vector<8x16xi1> to vector<8x16xi32>
    %36 = arith.sitofp %35 : vector<8x16xi32> to vector<8x16xf32>
    %c0_19 = arith.constant 0 : index
    %c0_20 = arith.constant 0 : index
    %37 = vector.load %arg4[%c0_19, %c0_20] : memref<16x384xf32, #tpu.memory_space<vmem>>, vector<16x384xf32>
    %cst_21 = arith.constant dense<0.000000e+00> : vector<8x384xf32>
    %38 = tpu.matmul %36, %37, %cst_21 {dimension_numbers = #tpu.dot_dimension_numbers<[1], [0], [0], [1], [0, 0, 1, 1], [], []>} : vector<8x16xf32>, vector<16x384xf32>, vector<8x384xf32> -> vector<8x384xf32>
    %39 = arith.addf %38, %30 : vector<8x384xf32>
    %40 = arith.truncf %39 : vector<8x384xf32> to vector<8x384xbf16>
    %c0_22 = arith.constant 0 : index
    %c0_23 = arith.constant 0 : index
    %41 = vector.load %arg9[%c0_22, %c0_23] : memref<384x256xbf16, #tpu.memory_space<vmem>>, vector<384x256xbf16>
    %cst_24 = arith.constant dense<0.000000e+00> : vector<8x256xf32>
    %42 = tpu.matmul %40, %41, %cst_24 {dimension_numbers = #tpu.dot_dimension_numbers<[1], [0], [0], [1], [0, 0, 1, 1], [], []>} : vector<8x384xbf16>, vector<384x256xbf16>, vector<8x256xf32> -> vector<8x256xf32>
    %c0_25 = arith.constant 0 : index
    %c0_26 = arith.constant 0 : index
    %43 = vector.load %arg10[%c0_25, %c0_26] : memref<1x256xf32, #tpu.memory_space<vmem>>, vector<1x256xf32>
    %44 = vector.broadcast %43 : vector<1x256xf32> to vector<8x256xf32>
    %45 = arith.addf %42, %44 : vector<8x256xf32>
    %cst_27 = arith.constant 0.000000e+00 : f32
    %46 = vector.broadcast %cst_27 : f32 to vector<8x256xf32>
    %47 = arith.maximumf %45, %46 : vector<8x256xf32>
    %48 = arith.truncf %47 : vector<8x256xf32> to vector<8x256xbf16>
    %c0_28 = arith.constant 0 : index
    %c0_29 = arith.constant 0 : index
    %49 = vector.load %arg11[%c0_28, %c0_29] : memref<256x896xbf16, #tpu.memory_space<vmem>>, vector<256x896xbf16>
    %cst_30 = arith.constant dense<0.000000e+00> : vector<8x896xf32>
    %50 = tpu.matmul %48, %49, %cst_30 {dimension_numbers = #tpu.dot_dimension_numbers<[1], [0], [0], [1], [0, 0, 1, 1], [], []>} : vector<8x256xbf16>, vector<256x896xbf16>, vector<8x896xf32> -> vector<8x896xf32>
    %c0_31 = arith.constant 0 : index
    %c0_32 = arith.constant 0 : index
    %51 = vector.load %arg12[%c0_31, %c0_32] : memref<1x896xf32, #tpu.memory_space<vmem>>, vector<1x896xf32>
    %52 = vector.broadcast %51 : vector<1x896xf32> to vector<8x896xf32>
    %53 = arith.addf %50, %52 : vector<8x896xf32>
    %cst_33 = arith.constant 0.000000e+00 : f32
    %54 = vector.broadcast %cst_33 : f32 to vector<8x896xf32>
    %55 = arith.subf %54, %53 : vector<8x896xf32>
    %56 = math.exp %55 : vector<8x896xf32>
    %cst_34 = arith.constant 1.000000e+00 : f32
    %57 = vector.broadcast %cst_34 : f32 to vector<8x896xf32>
    %58 = arith.addf %57, %56 : vector<8x896xf32>
    %59 = tpu.reciprocal %58 {approx = true} : vector<8x896xf32> -> vector<8x896xf32>
    %c0_35 = arith.constant 0 : index
    %c0_36 = arith.constant 0 : index
    %60 = vector.load %arg13[%c0_35, %c0_36] : memref<8x896xf32, #tpu.memory_space<vmem>>, vector<8x896xf32>
    tpu.vector_store %arg13[%c0_35, %c0_36], %59 {strides = array<i32>} : memref<8x896xf32, #tpu.memory_space<vmem>>, vector<8x896xf32>,
    %c0_37 = arith.constant 0 : index
    %c0_38 = arith.constant 0 : index
    %61 = vector.load %arg14[%c0_37, %c0_38] : memref<8x384xf32, #tpu.memory_space<vmem>>, vector<8x384xf32>
    tpu.vector_store %arg14[%c0_37, %c0_38], %23 {strides = array<i32>} : memref<8x384xf32, #tpu.memory_space<vmem>>, vector<8x384xf32>,
    %c0_39 = arith.constant 0 : index
    %c0_40 = arith.constant 0 : index
    %62 = vector.load %arg15[%c0_39, %c0_40] : memref<8x384xf32, #tpu.memory_space<vmem>>, vector<8x384xf32>
    tpu.vector_store %arg15[%c0_39, %c0_40], %24 {strides = array<i32>} : memref<8x384xf32, #tpu.memory_space<vmem>>, vector<8x384xf32>,
    return
  }
  func.func @transform_0(%arg0: i32) -> (i32, i32) {
    %c0_i32 = arith.constant 0 : i32
    %c0_i32_0 = arith.constant 0 : i32
    return %arg0, %c0_i32 : i32, i32
  }
  func.func @transform_1(%arg0: i32) -> (i32, i32) {
    %c0_i32 = arith.constant 0 : i32
    %c0_i32_0 = arith.constant 0 : i32
    return %arg0, %c0_i32 : i32, i32
  }
  func.func @transform_2(%arg0: i32) -> (i32, i32) {
    %c0_i32 = arith.constant 0 : i32
    %c0_i32_0 = arith.constant 0 : i32
    return %arg0, %c0_i32 : i32, i32
  }
  func.func @transform_3(%arg0: i32) -> (i32, i32) {
    %c0_i32 = arith.constant 0 : i32
    %c0_i32_0 = arith.constant 0 : i32
    %c0_i32_1 = arith.constant 0 : i32
    return %c0_i32, %c0_i32_0 : i32, i32
  }
  func.func @transform_4(%arg0: i32) -> (i32, i32) {
    %c0_i32 = arith.constant 0 : i32
    %c0_i32_0 = arith.constant 0 : i32
    %c0_i32_1 = arith.constant 0 : i32
    return %c0_i32, %c0_i32_0 : i32, i32
  }
  func.func @transform_5(%arg0: i32) -> (i32, i32) {
    %c0_i32 = arith.constant 0 : i32
    %c0_i32_0 = arith.constant 0 : i32
    %c0_i32_1 = arith.constant 0 : i32
    return %c0_i32, %c0_i32_0 : i32, i32
  }
  func.func @transform_6(%arg0: i32) -> (i32, i32) {
    %c0_i32 = arith.constant 0 : i32
    %c0_i32_0 = arith.constant 0 : i32
    %c0_i32_1 = arith.constant 0 : i32
    return %c0_i32, %c0_i32_0 : i32, i32
  }
  func.func @transform_7(%arg0: i32) -> (i32, i32) {
    %c0_i32 = arith.constant 0 : i32
    %c0_i32_0 = arith.constant 0 : i32
    %c0_i32_1 = arith.constant 0 : i32
    return %c0_i32, %c0_i32_0 : i32, i32
  }
  func.func @transform_8(%arg0: i32) -> (i32, i32) {
    %c0_i32 = arith.constant 0 : i32
    %c0_i32_0 = arith.constant 0 : i32
    %c0_i32_1 = arith.constant 0 : i32
    return %c0_i32, %c0_i32_0 : i32, i32
  }
  func.func @transform_9(%arg0: i32) -> (i32, i32) {
    %c0_i32 = arith.constant 0 : i32
    %c0_i32_0 = arith.constant 0 : i32
    %c0_i32_1 = arith.constant 0 : i32
    return %c0_i32, %c0_i32_0 : i32, i32
  }
  func.func @transform_10(%arg0: i32) -> (i32, i32) {
    %c0_i32 = arith.constant 0 : i32
    %c0_i32_0 = arith.constant 0 : i32
    %c0_i32_1 = arith.constant 0 : i32
    return %c0_i32, %c0_i32_0 : i32, i32
  }
  func.func @transform_11(%arg0: i32) -> (i32, i32) {
    %c0_i32 = arith.constant 0 : i32
    %c0_i32_0 = arith.constant 0 : i32
    %c0_i32_1 = arith.constant 0 : i32
    return %c0_i32, %c0_i32_0 : i32, i32
  }
  func.func @transform_12(%arg0: i32) -> (i32, i32) {
    %c0_i32 = arith.constant 0 : i32
    %c0_i32_0 = arith.constant 0 : i32
    return %arg0, %c0_i32 : i32, i32
  }
  func.func @transform_13(%arg0: i32) -> (i32, i32) {
    %c0_i32 = arith.constant 0 : i32
    %c0_i32_0 = arith.constant 0 : i32
    return %arg0, %c0_i32 : i32, i32
  }
  func.func @transform_14(%arg0: i32) -> (i32, i32) {
    %c0_i32 = arith.constant 0 : i32
    %c0_i32_0 = arith.constant 0 : i32
    return %arg0, %c0_i32 : i32, i32
  }
}

</mosaic_0001>

<bundles_post_ra>
// kernel: vae_forward.1
= control target key start
LH: loop header
LB: loop body
LE: loop exit
PB: predicated region body
PF: predicated region fallthrough
CT: control target
= control target key end

     0   :  { %20 = vsyncpa [#allocation3], 0  ;;  %s4635_s0 = inlined_call_operand.vmem [shape: f32[8,784], index: 0, kind: input, shape index: {}]   ;;  %s4636_s1 = inlined_call_operand.vmem [shape: f32[8,384], index: 1, kind: input, shape index: {}]   ;;  %s4637_s2 = inlined_call_operand.vmem [shape: s32[8,1], index: 2, kind: input, shape index: {}]   ;;  %s4638_s3 = inlined_call_operand.vmem [shape: f32[16,384], index: 3, kind: input, shape index: {}]   ;;  %s4639_s4 = inlined_call_operand.hbm [shape: bf16[784,256], index: 4, kind: input, shape index: {}]   ;;  %s4640_s5 = inlined_call_operand.vmem [shape: f32[1,256], index: 5, kind: input, shape index: {}]   ;;  %s4641_s6 = inlined_call_operand.hbm [shape: bf16[256,768], index: 6, kind: input, shape index: {}]   ;;  %s4642_s7 = inlined_call_operand.vmem [shape: f32[1,768], index: 7, kind: input, shape index: {}]   ;;  %s4643_s8 = inlined_call_operand.hbm [shape: bf16[384,256], index: 8, kind: input, shape index: {}]   ;;  %s4644_s9 = inlined_call_operand.vmem [shape: f32[1,256], index: 9, kind: input, shape index: {}]   ;;  %s4645_s10 = inlined_call_operand.hbm [shape: bf16[256,896], index: 10, kind: input, shape index: {}]   ;;  %s4646_s11 = inlined_call_operand.vmem [shape: f32[1,896], index: 11, kind: input, shape index: {}]   ;;  %s4647_s12 = inlined_call_operand.vmem [shape: f32[8,896], index: 12, kind: output, shape index: {0}]   ;;  %s4648_s13 = inlined_call_operand.vmem [shape: f32[8,384], index: 13, kind: output, shape index: {1}]   ;;  %s4649_s14 = inlined_call_operand.vmem [shape: f32[8,384], index: 14, kind: output, shape index: {2}]  }
   0x1   :  { %21 = vsyncpa [#allocation5], 0 }
   0x2   :  { %22 = vsyncpa [#allocation8], 0  ;;  %s4293_s29 = smov [#allocation4]   ;;  %s4199_s17 = scalar_lea.hbm %s4641_s6, 12288 }
   0x3   :  { %s50_s30 = sshll.u32 %s4293_s29, 4  ;;  %p4200_p0 = scmp.ne.s32.totalorder %s4641_s6, %s4199_s17  ;;  %s51_s30 = int_to_ptr.vmem [resolvable:$true] %s50_s30 }
   0x4   :  { %p4203_p1 = scmp.lt.u32.totalorder %s4199_s17, %s4641_s6 }
   0x6   :  { %p4205_p2 = pnand %p4203_p1, %p4200_p0 }
   0x8   :  { %4208 = shalt.err (!%p4205_p2)
}
   0x9   :  { %s4209_s22 = scalar_lea.vmem %s51_s30, 12288  ;;  %p4214_p4 = scmp.lt.s32.totalorder %s51_s30, %s51_s30 }
   0xa   :  { %p4210_p3 = scmp.ne.s32.totalorder %s51_s30, %s4209_s22  ;;  %p4215_p5 = scmp.lt.s32.totalorder %s4209_s22, %s4209_s22 }
   0xc   :  { %p4216_p6 = por %p4215_p5, %p4214_p4 }
   0xe   :  { %p4217_p7 = pnand %p4216_p6, %p4210_p3 }
  0x10   :  { %4220 = shalt.err (!%p4217_p7)
}
  0x11   :  { %s4294_s23 = smov 384   ;;  %s4295_s24 = smov 24  }
  0x12   :  { %56 = dma.hbm_to_vmem [thread:$0]  %s4641_s6, 12288, %s51_s30, [#allocation5], %s4294_s23, %s4294_s23, %s4295_s24  }
  0x13   :  { %s4296_s27 = smov [#allocation2]   ;;  %s4221_s16 = scalar_lea.hbm %s4639_s4, 12544 }
  0x14   :  { %s36_s28 = sshll.u32 %s4296_s27, 4  ;;  %p4222_p8 = scmp.ne.s32.totalorder %s4639_s4, %s4221_s16  ;;  %s37_s28 = int_to_ptr.vmem [resolvable:$true] %s36_s28 }
  0x15   :  { %p4225_p9 = scmp.lt.u32.totalorder %s4221_s16, %s4639_s4 }
  0x17   :  { %p4227_p10 = pnand %p4225_p9, %p4222_p8 }
  0x19   :  { %4230 = shalt.err (!%p4227_p10)
}
  0x1a   :  { %s4231_s21 = scalar_lea.vmem %s37_s28, 12544  ;;  %p4236_p12 = scmp.lt.s32.totalorder %s37_s28, %s37_s28 }
  0x1b   :  { %p4232_p11 = scmp.ne.s32.totalorder %s37_s28, %s4231_s21  ;;  %p4237_p13 = scmp.lt.s32.totalorder %s4231_s21, %s4231_s21 }
  0x1d   :  { %p4238_p0 = por %p4237_p13, %p4236_p12 }
  0x1f   :  { %p4239_p1 = pnand %p4238_p0, %p4232_p11 }
  0x21   :  { %4242 = shalt.err (!%p4239_p1)
}
  0x22   :  { %s4297_s6 = smov 128   ;;  %s4298_s30 = smov 8  }
  0x23   :  { %42 = dma.hbm_to_vmem [thread:$0]  %s4639_s4, 12544, %s37_s28, [#allocation3], %s4297_s6, %s4297_s6, %s4298_s30  }
  0x24   :  { %s4299_s24 = smov [#allocation6]   ;;  %s4300_s26 = smov [#allocation7]  }
  0x25   :  { %s64_s25 = sshll.u32 %s4299_s24, 4  ;;  %s78_s27 = sshll.u32 %s4300_s26, 4  ;;  %s65_s25 = int_to_ptr.vmem [resolvable:$true] %s64_s25  ;;  %s4406_s27 = int_to_ptr.vmem [resolvable:$true] %s78_s27 }
  0x26   :  { %s4243_s16 = scalar_lea.hbm %s4643_s8, 6144 }
  0x27   :  { %p4244_p2 = scmp.ne.s32.totalorder %s4643_s8, %s4243_s16  ;;  %p4247_p3 = scmp.lt.u32.totalorder %s4243_s16, %s4643_s8 }
  0x29   :  { %p4249_p4 = pnand %p4247_p3, %p4244_p2 }
  0x2b   :  { %4252 = shalt.err (!%p4249_p4)
}
  0x2c   :  { %s4253_s4 = scalar_lea.vmem %s65_s25, 6144  ;;  %p4258_p6 = scmp.lt.s32.totalorder %s65_s25, %s65_s25 }
  0x2d   :  { %p4254_p5 = scmp.ne.s32.totalorder %s65_s25, %s4253_s4  ;;  %p4259_p7 = scmp.lt.s32.totalorder %s4253_s4, %s4253_s4 }
  0x2f   :  { %p4260_p8 = por %p4259_p7, %p4258_p6 }
  0x31   :  { %p4261_p9 = pnand %p4260_p8, %p4254_p5 }
  0x33   :  { %4264 = shalt.err (!%p4261_p9)
}
  0x34   :  { %70 = dma.hbm_to_vmem [thread:$0]  %s4643_s8, 6144, %s65_s25, [#allocation5], %s4297_s6, %s4297_s6, %s4298_s30  }
  0x35   :  { %s4265_s24 = scalar_lea.hbm %s4645_s10, 14336 }
  0x36   :  { %p4266_p10 = scmp.ne.s32.totalorder %s4645_s10, %s4265_s24  ;;  %p4269_p11 = scmp.lt.u32.totalorder %s4265_s24, %s4645_s10 }
  0x38   :  { %p4271_p12 = pnand %p4269_p11, %p4266_p10 }
  0x3a   :  { %4274 = shalt.err (!%p4271_p12)
}
  0x3b   :  { %s4275_s17 = scalar_lea.vmem %s4406_s27, 14336  ;;  %p4280_p0 = scmp.lt.s32.totalorder %s4406_s27, %s4406_s27 }
  0x3c   :  { %p4276_p13 = scmp.ne.s32.totalorder %s4406_s27, %s4275_s17  ;;  %p4281_p1 = scmp.lt.s32.totalorder %s4275_s17, %s4275_s17 }
  0x3e   :  { %p4282_p2 = por %p4281_p1, %p4280_p0 }
  0x40   :  { %p4283_p3 = pnand %p4282_p2, %p4276_p13 }
  0x42   :  { %4286 = shalt.err (!%p4283_p3)
}
  0x43   :  { %s4301_s8 = smov 448   ;;  %s4302_s6 = smov 28  }
  0x44   :  { %84 = dma.hbm_to_vmem [thread:$0]  %s4645_s10, 14336, %s4406_s27, [#allocation8], %s4301_s8, %s4301_s8, %s4302_s6  }
  0x45   :  { %4287 = dma.done.wait [#allocation3], 12544  }
  0x46   :  { %4288 = vsyncadd [#allocation3], 4294954752 }
  0x47   :  { %4289 = dma.done.wait [#allocation5], 18432  }
  0x48   :  { %4290 = vsyncadd [#allocation5], 4294948864 }
  0x49   :  { %4291 = dma.done.wait [#allocation8], 14336  }
  0x4a   :  { %4292 = vsyncadd [#allocation8], 4294952960  ;;  %v3618_v0 = vld [vmem:[#allocation2 + $0x4] ss:$8 sps:$4 sm:$0xff]   ;;  %v3620_v1 = vld [vmem:[#allocation2] ss:$8 sps:$4 sm:$0xff]  }
  0x4b   :  { %718 = vmatprep.subr.bf16.mxu0 %v3618_v0  ;;  %v3621_v2 = vld [vmem:[#allocation2 + $0x14] ss:$8 sps:$4 sm:$0xff]   ;;  %v3623_v3 = vld [vmem:[#allocation2 + $0x10] ss:$8 sps:$4 sm:$0xff]   ;;  %v3624_v4 = vld [vmem:[#allocation2 + $0x24] ss:$8 sps:$4 sm:$0xff]  }
  0x4c   :  { %719 = vmatpush1.bf16.msra.mxu0 %v3620_v1  ;;  %v3626_v5 = vld [vmem:[#allocation2 + $0x20] ss:$8 sps:$4 sm:$0xff]   ;;  %v3627_v6 = vld [vmem:[#allocation2 + $0x34] ss:$8 sps:$4 sm:$0xff]   ;;  %v3629_v7 = vld [vmem:[#allocation2 + $0x30] ss:$8 sps:$4 sm:$0xff]  }
  0x4d   :  { %720 = vmatprep.subr.bf16.mxu0 %v3621_v2  ;;  %v3630_v8 = vld [vmem:[#allocation2 + $0x44] ss:$8 sps:$4 sm:$0xff]   ;;  %v3632_v9 = vld [vmem:[#allocation2 + $0x40] ss:$8 sps:$4 sm:$0xff]   ;;  %v3633_v10 = vld [vmem:[#allocation2 + $0x54] ss:$8 sps:$4 sm:$0xff]  }
  0x4e   :  { %v3635_v11 = vld [vmem:[#allocation2 + $0x50] ss:$8 sps:$4 sm:$0xff]   ;;  %v3636_v12 = vld [vmem:[#allocation2 + $0x64] ss:$8 sps:$4 sm:$0xff]   ;;  %v3638_v15 = vld [vmem:[#allocation2 + $0x60] ss:$8 sps:$4 sm:$0xff]  }
  0x4f   :  { %v101_v13 = vld [vmem:[%s4635_s0 + $0x8] sm:$0xff]  ;;  %v3639_v16 = vld [vmem:[#allocation2 + $0x74] ss:$8 sps:$4 sm:$0xff]   ;;  %v3641_v17 = vld [vmem:[#allocation2 + $0x70] ss:$8 sps:$4 sm:$0xff]   ;;  %v4303_v43 = vmov 0  }
  0x50   :  { %721 = vmatpush1.bf16.msra.mxu0 %v3623_v3  ;;  %v108_v14 = vpack.c.bf16 %v101_v13, %v101_v13  ;;  %v3642_v18 = vld [vmem:[#allocation2 + $0x84] ss:$8 sps:$4 sm:$0xff]   ;;  %v3644_v19 = vld [vmem:[#allocation2 + $0x80] ss:$8 sps:$4 sm:$0xff]   ;;  %v3645_v20 = vld [vmem:[#allocation2 + $0x94] ss:$8 sps:$4 sm:$0xff]   ;;  %3617 = vset.pattern.permute.xlu0 %v4303_v43 }
  0x51   :  { %722 = vmatprep.subr.bf16.mxu0 %v3624_v4  ;;  %v3647_v21 = vld [vmem:[#allocation2 + $0x90] ss:$8 sps:$4 sm:$0xff]   ;;  %v3648_v22 = vld [vmem:[#allocation2 + $0xa4] ss:$8 sps:$4 sm:$0xff]   ;;  %v3650_v23 = vld [vmem:[#allocation2 + $0xa0] ss:$8 sps:$4 sm:$0xff]  }
  0x52   :  { %750 = vmatprep.mubr.bf16.mxu0 %v108_v14  ;;  %v3651_v24 = vld [vmem:[#allocation2 + $0xb4] ss:$8 sps:$4 sm:$0xff]   ;;  %v3653_v25 = vld [vmem:[#allocation2 + $0xb0] ss:$8 sps:$4 sm:$0xff]   ;;  %v3654_v26 = vld [vmem:[#allocation2 + $0xc4] ss:$8 sps:$4 sm:$0xff]  }
  0x53   :  { %v3656_v27 = vld [vmem:[#allocation2 + $0xc0] ss:$8 sps:$4 sm:$0xff]   ;;  %v3657_v28 = vld [vmem:[#allocation2 + $0xd4] ss:$8 sps:$4 sm:$0xff]   ;;  %v3659_v29 = vld [vmem:[#allocation2 + $0xd0] ss:$8 sps:$4 sm:$0xff]  }
  0x54   :  { %723 = vmatpush1.bf16.msra.mxu0 %v3626_v5  ;;  %v3660_v30 = vld [vmem:[#allocation2 + $0xe4] ss:$8 sps:$4 sm:$0xff]   ;;  %v3662_v31 = vld [vmem:[#allocation2 + $0xe0] ss:$8 sps:$4 sm:$0xff]   ;;  %v3663_v32 = vld [vmem:[#allocation2 + $0xf4] ss:$8 sps:$4 sm:$0xff]  }
  0x55   :  { %724 = vmatprep.subr.bf16.mxu0 %v3627_v6  ;;  %v3665_v33 = vld [vmem:[#allocation2 + $0xf0] ss:$8 sps:$4 sm:$0xff]   ;;  %v3668_v34 = vld [vmem:[#allocation2 + $0x104] ss:$8 sps:$4 sm:$0xff]   ;;  %v3666_v38 = vld [vmem:[#allocation2 + $0x100] ss:$8 sps:$4 sm:$0xff]  }
  0x56   :  { %v100_v35 = vld [vmem:[%s4635_s0] sm:$0xff]  ;;  %v103_v36 = vld [vmem:[%s4635_s0 + $0x18] sm:$0xff]  ;;  %v3765_v48 = vld [vmem:[#allocation4 + $0x4] ss:$24 sps:$4 sm:$0xff]   ;;  %vm714_vm0 = vcmask 130048   ;;  %vm4306_vm2 = vmmov 0  }
  0x57   :  { %v107_v37 = vpack.c.bf16 %v100_v35, %v100_v35  ;;  %v110_v39 = vpack.c.bf16 %v103_v36, %v103_v36  ;;  %v3671_v40 = vld [vmem:[#allocation2 + $0x114] ss:$8 sps:$4 sm:$0xff]   ;;  %v3669_v41 = vld [vmem:[#allocation2 + $0x110] ss:$8 sps:$4 sm:$0xff]   ;;  %v3674_v42 = vld [vmem:[#allocation2 + $0x124] ss:$8 sps:$4 sm:$0xff]   ;;  %1494 = vmatprep.subr.bf16.mxu1 %v3765_v48 }
  0x58   :  { %725 = vmatpush1.bf16.msra.mxu0 %v3629_v7  ;;  %v3672_v44 = vld [vmem:[#allocation2 + $0x120] ss:$8 sps:$4 sm:$0xff]   ;;  %v3677_v45 = vld [vmem:[#allocation2 + $0x134] ss:$8 sps:$4 sm:$0xff]   ;;  %v3675_v46 = vld [vmem:[#allocation2 + $0x130] ss:$8 sps:$4 sm:$0xff]  }
  0x59   :  { %726 = vmatprep.subr.bf16.mxu0 %v3630_v8  ;;  %v3680_v47 = vld [vmem:[#allocation2 + $0x144] ss:$8 sps:$4 sm:$0xff]   ;;  %v3767_v49 = vld [vmem:[#allocation4] ss:$24 sps:$4 sm:$0xff]   ;;  %v3683_v52 = vld [vmem:[#allocation2 + $0x154] ss:$8 sps:$4 sm:$0xff]  }
  0x5a   :  { %v3768_v50 = vld [vmem:[#allocation4 + $0x34] ss:$24 sps:$4 sm:$0xff]   ;;  %v3678_v51 = vld [vmem:[#allocation2 + $0x140] ss:$8 sps:$4 sm:$0xff]   ;;  %1495 = vmatpush1.bf16.msra.mxu1 %v3767_v49  ;;  %v3771_v54 = vld [vmem:[#allocation4 + $0x64] ss:$24 sps:$4 sm:$0xff]  }
  0x5b   :  { %v3770_v53 = vld [vmem:[#allocation4 + $0x30] ss:$24 sps:$4 sm:$0xff]   ;;  %1496 = vmatprep.subr.bf16.mxu1 %v3768_v50  ;;  %v3686_v56 = vld [vmem:[#allocation2 + $0x164] ss:$8 sps:$4 sm:$0xff]   ;;  %v3773_v57 = vld [vmem:[#allocation4 + $0x60] ss:$24 sps:$4 sm:$0xff]  }
  0x5c   :  { %727 = vmatpush1.bf16.msra.mxu0 %v3632_v9  ;;  %v3681_v55 = vld [vmem:[#allocation2 + $0x150] ss:$8 sps:$4 sm:$0xff]   ;;  %v3684_v58 = vld [vmem:[#allocation2 + $0x160] ss:$8 sps:$4 sm:$0xff]   ;;  %v3774_v59 = vld [vmem:[#allocation4 + $0x94] ss:$24 sps:$4 sm:$0xff]  }
  0x5d   :  { %728 = vmatprep.subr.bf16.mxu0 %v3633_v10  ;;  %v3689_v60 = vld [vmem:[#allocation2 + $0x174] ss:$8 sps:$4 sm:$0xff]   ;;  %v3776_v61 = vld [vmem:[#allocation4 + $0x90] ss:$24 sps:$4 sm:$0xff]   ;;  %v3692_v0 = vld [vmem:[#allocation2 + $0x184] ss:$8 sps:$4 sm:$0xff]  }
  0x5e   :  { %1497 = vmatpush1.bf16.msra.mxu1 %v3770_v53  ;;  %v3777_v62 = vld [vmem:[#allocation4 + $0xc4] ss:$24 sps:$4 sm:$0xff]   ;;  %v3687_v63 = vld [vmem:[#allocation2 + $0x170] ss:$8 sps:$4 sm:$0xff]   ;;  %v3780_v2 = vld [vmem:[#allocation4 + $0xf4] ss:$24 sps:$4 sm:$0xff]  }
  0x5f   :  { %1498 = vmatprep.subr.bf16.mxu1 %v3771_v54  ;;  %v3779_v1 = vld [vmem:[#allocation4 + $0xc0] ss:$24 sps:$4 sm:$0xff]   ;;  %v3695_v4 = vld [vmem:[#allocation2 + $0x194] ss:$8 sps:$4 sm:$0xff]   ;;  %v3782_v5 = vld [vmem:[#allocation4 + $0xf0] ss:$24 sps:$4 sm:$0xff]  }
  0x60   :  { %729 = vmatpush1.bf16.msra.mxu0 %v3635_v11  ;;  %v3690_v3 = vld [vmem:[#allocation2 + $0x180] ss:$8 sps:$4 sm:$0xff]   ;;  %v3783_v6 = vld [vmem:[#allocation4 + $0x124] ss:$24 sps:$4 sm:$0xff]   ;;  %v3693_v7 = vld [vmem:[#allocation2 + $0x190] ss:$8 sps:$4 sm:$0xff]  }
  0x61   :  { %730 = vmatprep.subr.bf16.mxu0 %v3636_v12  ;;  %v3698_v8 = vld [vmem:[#allocation2 + $0x1a4] ss:$8 sps:$4 sm:$0xff]   ;;  %v3785_v9 = vld [vmem:[#allocation4 + $0x120] ss:$24 sps:$4 sm:$0xff]   ;;  %v3701_v12 = vld [vmem:[#allocation2 + $0x1b4] ss:$8 sps:$4 sm:$0xff]  }
  0x62   :  { %1499 = vmatpush1.bf16.msra.mxu1 %v3773_v57  ;;  %v3786_v10 = vld [vmem:[#allocation4 + $0x154] ss:$24 sps:$4 sm:$0xff]   ;;  %v3696_v11 = vld [vmem:[#allocation2 + $0x1a0] ss:$8 sps:$4 sm:$0xff]   ;;  %v3789_v14 = vld [vmem:[#allocation4 + $0x184] ss:$24 sps:$4 sm:$0xff]  }
  0x63   :  { %1500 = vmatprep.subr.bf16.mxu1 %v3774_v59  ;;  %v3788_v13 = vld [vmem:[#allocation4 + $0x150] ss:$24 sps:$4 sm:$0xff]   ;;  %v3803_v35 = vld [vmem:[#allocation4 + $0x240] ss:$24 sps:$4 sm:$0xff]   ;;  %v3804_v36 = vld [vmem:[#allocation4 + $0x274] ss:$24 sps:$4 sm:$0xff]  }
  0x64   :  { %731 = vmatpush1.bf16.msra.mxu0 %v3638_v15  ;;  %v3699_v15 = vld [vmem:[#allocation2 + $0x1b0] ss:$8 sps:$4 sm:$0xff]   ;;  %v3728_v48 = vld [vmem:[#allocation2 + $0x244] ss:$8 sps:$4 sm:$0xff]   ;;  %v3726_v49 = vld [vmem:[#allocation2 + $0x240] ss:$8 sps:$4 sm:$0xff]  }
  0x65   :  { %732 = vmatprep.subr.bf16.mxu0 %v3639_v16  ;;  %v3704_v16 = vld [vmem:[#allocation2 + $0x1c4] ss:$8 sps:$4 sm:$0xff]   ;;  %v3731_v50 = vld [vmem:[#allocation2 + $0x254] ss:$8 sps:$4 sm:$0xff]   ;;  %v3732_v53 = vld [vmem:[#allocation2 + $0x260] ss:$8 sps:$4 sm:$0xff]  }
  0x66   :  { %1501 = vmatpush1.bf16.msra.mxu1 %v3776_v61  ;;  %v3737_v54 = vld [vmem:[#allocation2 + $0x274] ss:$8 sps:$4 sm:$0xff]   ;;  %v3738_v57 = vld [vmem:[#allocation2 + $0x280] ss:$8 sps:$4 sm:$0xff]   ;;  %v3741_v59 = vld [vmem:[#allocation2 + $0x290] ss:$8 sps:$4 sm:$0xff]  }
  0x67   :  { %1502 = vmatprep.subr.bf16.mxu1 %v3777_v62  ;;  %v3744_v61 = vld [vmem:[#allocation2 + $0x2a0] ss:$8 sps:$4 sm:$0xff]   ;;  %v3749_v62 = vld [vmem:[#allocation2 + $0x2b4] ss:$8 sps:$4 sm:$0xff]  }
  0x68   :  { %733 = vmatpush1.bf16.msra.mxu0 %v3641_v17  ;;  %v3791_v17 = vld [vmem:[#allocation4 + $0x180] ss:$24 sps:$4 sm:$0xff]  }
  0x69   :  { %734 = vmatprep.subr.bf16.mxu0 %v3642_v18  ;;  %v3792_v18 = vld [vmem:[#allocation4 + $0x1b4] ss:$24 sps:$4 sm:$0xff]  }
  0x6a   :  { %1503 = vmatpush1.bf16.msra.mxu1 %v3779_v1  ;;  %v3750_v1 = vld [vmem:[#allocation2 + $0x2c0] ss:$8 sps:$4 sm:$0xff]  }
  0x6b   :  { %1504 = vmatprep.subr.bf16.mxu1 %v3780_v2  ;;  %v3755_v2 = vld [vmem:[#allocation2 + $0x2d4] ss:$8 sps:$4 sm:$0xff]  }
  0x6c   :  { %735 = vmatpush1.bf16.msra.mxu0 %v3644_v19  ;;  %v3702_v19 = vld [vmem:[#allocation2 + $0x1c0] ss:$8 sps:$4 sm:$0xff]  }
  0x6d   :  { %736 = vmatprep.subr.bf16.mxu0 %v3645_v20  ;;  %v3707_v20 = vld [vmem:[#allocation2 + $0x1d4] ss:$8 sps:$4 sm:$0xff]  }
  0x6e   :  { %1505 = vmatpush1.bf16.msra.mxu1 %v3782_v5  ;;  %v3756_v5 = vld [vmem:[#allocation2 + $0x2e0] ss:$8 sps:$4 sm:$0xff]  }
  0x6f   :  { %1506 = vmatprep.subr.bf16.mxu1 %v3783_v6  ;;  %v3761_v6 = vld [vmem:[#allocation2 + $0x2f4] ss:$8 sps:$4 sm:$0xff]  }
  0x70   :  { %737 = vmatpush1.bf16.msra.mxu0 %v3647_v21  ;;  %v3794_v21 = vld [vmem:[#allocation4 + $0x1b0] ss:$24 sps:$4 sm:$0xff]  }
  0x71   :  { %738 = vmatprep.subr.bf16.mxu0 %v3648_v22  ;;  %v3795_v22 = vld [vmem:[#allocation4 + $0x1e4] ss:$24 sps:$4 sm:$0xff]  }
  0x72   :  { %1507 = vmatpush1.bf16.msra.mxu1 %v3785_v9  ;;  %v3764_v9 = vld [vmem:[#allocation2 + $0x304] ss:$8 sps:$4 sm:$0xff]  }
  0x73   :  { %1508 = vmatprep.subr.bf16.mxu1 %v3786_v10 }
  0x74   :  { %739 = vmatpush1.bf16.msra.mxu0 %v3650_v23  ;;  %v3705_v23 = vld [vmem:[#allocation2 + $0x1d0] ss:$8 sps:$4 sm:$0xff]  }
  0x75   :  { %740 = vmatprep.subr.bf16.mxu0 %v3651_v24  ;;  %v3710_v24 = vld [vmem:[#allocation2 + $0x1e4] ss:$8 sps:$4 sm:$0xff]  }
  0x76   :  { %1509 = vmatpush1.bf16.msra.mxu1 %v3788_v13 }
  0x77   :  { %1510 = vmatprep.subr.bf16.mxu1 %v3789_v14  ;;  %v3807_v14 = vld [vmem:[#allocation4 + $0x2a4] ss:$24 sps:$4 sm:$0xff]  }
  0x78   :  { %741 = vmatpush1.bf16.msra.mxu0 %v3653_v25  ;;  %v3797_v25 = vld [vmem:[#allocation4 + $0x1e0] ss:$24 sps:$4 sm:$0xff]  }
  0x79   :  { %742 = vmatprep.subr.bf16.mxu0 %v3654_v26  ;;  %v3798_v26 = vld [vmem:[#allocation4 + $0x214] ss:$24 sps:$4 sm:$0xff]  }
  0x7a   :  { %1511 = vmatpush1.bf16.msra.mxu1 %v3791_v17  ;;  %v3812_v17 = vld [vmem:[#allocation4 + $0x2d0] ss:$24 sps:$4 sm:$0xff]  }
  0x7b   :  { %1512 = vmatprep.subr.bf16.mxu1 %v3792_v18  ;;  %v3815_v18 = vld [vmem:[#allocation4 + $0xc] ss:$24 sps:$4 sm:$0xff]  }
  0x7c   :  { %743 = vmatpush1.bf16.msra.mxu0 %v3656_v27  ;;  %v3708_v27 = vld [vmem:[#allocation2 + $0x1e0] ss:$8 sps:$4 sm:$0xff]  }
  0x7d   :  { %744 = vmatprep.subr.bf16.mxu0 %v3657_v28  ;;  %v3713_v28 = vld [vmem:[#allocation2 + $0x1f4] ss:$8 sps:$4 sm:$0xff]  }
  0x7e   :  { %1513 = vmatpush1.bf16.msra.mxu1 %v3794_v21 }
  0x7f   :  { %1514 = vmatprep.subr.bf16.mxu1 %v3795_v22 }
  0x80   :  { %745 = vmatpush1.bf16.msra.mxu0 %v3659_v29  ;;  %v3800_v29 = vld [vmem:[#allocation4 + $0x210] ss:$24 sps:$4 sm:$0xff]  }
  0x81   :  { %746 = vmatprep.subr.bf16.mxu0 %v3660_v30  ;;  %v3801_v30 = vld [vmem:[#allocation4 + $0x244] ss:$24 sps:$4 sm:$0xff]  }
  0x82   :  { %1515 = vmatpush1.bf16.msra.mxu1 %v3797_v25 }
  0x83   :  { %1516 = vmatprep.subr.bf16.mxu1 %v3798_v26 }
  0x84   :  { %747 = vmatpush1.bf16.msra.mxu0 %v3662_v31  ;;  %v3711_v31 = vld [vmem:[#allocation2 + $0x1f0] ss:$8 sps:$4 sm:$0xff]  }
  0x85   :  { %748 = vmatprep.subr.bf16.mxu0 %v3663_v32  ;;  %v102_v32 = vld [vmem:[%s4635_s0 + $0x10] sm:$0xff] }
  0x86   :  { %1517 = vmatpush1.bf16.msra.mxu1 %v3800_v29 }
  0x87   :  { %1518 = vmatprep.subr.bf16.mxu1 %v3801_v30 }
  0x88   :  { %749 = vmatpush1.bf16.msra.mxu0 %v3665_v33  ;;  %v3716_v33 = vld [vmem:[#allocation2 + $0x204] ss:$8 sps:$4 sm:$0xff]  }
  0x89   :  { %759 = vmatprep.subr.bf16.mxu0 %v3668_v34  ;;  %v105_v34 = vld [vmem:[%s4635_s0 + $0x28] sm:$0xff] }
  0x8a   :  { %1519 = vmatpush1.bf16.msra.mxu1 %v3803_v35 }
  0x8b   :  { %751 = vmatmul.mubr.bf16.vlgmr.msra.gmra.mrb[0].mxu0 %v107_v37  ;;  %v3714_v37 = vld [vmem:[#allocation2 + $0x200] ss:$8 sps:$4 sm:$0xff]   ;;  %1520 = vmatprep.subr.bf16.mxu1 %v3804_v36  ;;  %v3813_v36 = vld [vmem:[#allocation4 + $0x8] ss:$24 sps:$4 sm:$0xff]  }
  0x8c   :  { %760 = vmatpush1.bf16.msra.mxu0 %v3666_v38  ;;  %791 = vmatprep.mubr.bf16.mxu0 %v110_v39  ;;  %v109_v38 = vpack.c.bf16 %v102_v32, %v102_v32  ;;  %v3719_v39 = vld [vmem:[#allocation2 + $0x214] ss:$8 sps:$4 sm:$0xff]  }
  0x8d   :  { %761 = vmatprep.subr.bf16.mxu0 %v3671_v40  ;;  %v112_v40 = vpack.c.bf16 %v105_v34, %v105_v34 }
  0x90   :  { %762 = vmatpush1.bf16.msra.mxu0 %v3669_v41  ;;  %v3806_v41 = vld [vmem:[#allocation4 + $0x270] ss:$24 sps:$4 sm:$0xff]  }
  0x91   :  { %763 = vmatprep.subr.bf16.mxu0 %v3674_v42  ;;  %v3717_v42 = vld [vmem:[#allocation2 + $0x210] ss:$8 sps:$4 sm:$0xff]   ;;  %1521 = vmatpush1.bf16.msra.mxu1 %v3806_v41 }
  0x92   :  { %1522 = vmatprep.subr.bf16.mxu1 %v3807_v14  ;;  %v3819_v41 = vld [vmem:[#allocation4 + $0x68] ss:$24 sps:$4 sm:$0xff]  }
  0x93   :  { %v3873_v14 = vld [vmem:[#allocation4 + $0xd0] ss:$24 sps:$4 sm:$0xff]  }
  0x94   :  { %764 = vmatpush1.bf16.msra.mxu0 %v3672_v44  ;;  %v3722_v44 = vld [vmem:[#allocation2 + $0x224] ss:$8 sps:$4 sm:$0xff]  }
  0x95   :  { %765 = vmatprep.subr.bf16.mxu0 %v3677_v45  ;;  %v3720_v45 = vld [vmem:[#allocation2 + $0x220] ss:$8 sps:$4 sm:$0xff]  }
  0x98   :  { %766 = vmatpush1.bf16.msra.mxu0 %v3675_v46  ;;  %v3725_v46 = vld [vmem:[#allocation2 + $0x234] ss:$8 sps:$4 sm:$0xff]  }
  0x99   :  { %767 = vmatprep.subr.bf16.mxu0 %v3680_v47  ;;  %v3723_v47 = vld [vmem:[#allocation2 + $0x230] ss:$8 sps:$4 sm:$0xff]  }
  0x9c   :  { %768 = vmatpush1.bf16.msra.mxu0 %v3678_v51  ;;  %v3729_v51 = vld [vmem:[#allocation2 + $0x250] ss:$8 sps:$4 sm:$0xff]  }
  0x9d   :  { %769 = vmatprep.subr.bf16.mxu0 %v3683_v52  ;;  %v3734_v52 = vld [vmem:[#allocation2 + $0x264] ss:$8 sps:$4 sm:$0xff]  }
  0xa0   :  { %770 = vmatpush1.bf16.msra.mxu0 %v3681_v55  ;;  %v3735_v55 = vld [vmem:[#allocation2 + $0x270] ss:$8 sps:$4 sm:$0xff]  }
  0xa1   :  { %771 = vmatprep.subr.bf16.mxu0 %v3686_v56  ;;  %v3740_v56 = vld [vmem:[#allocation2 + $0x284] ss:$8 sps:$4 sm:$0xff]  }
  0xa4   :  { %772 = vmatpush1.bf16.msra.mxu0 %v3684_v58  ;;  %v3743_v58 = vld [vmem:[#allocation2 + $0x294] ss:$8 sps:$4 sm:$0xff]  }
  0xa5   :  { %773 = vmatprep.subr.bf16.mxu0 %v3689_v60  ;;  %v3746_v60 = vld [vmem:[#allocation2 + $0x2a4] ss:$8 sps:$4 sm:$0xff]  }
  0xa8   :  { %774 = vmatpush1.bf16.msra.mxu0 %v3687_v63  ;;  %v3747_v63 = vld [vmem:[#allocation2 + $0x2b0] ss:$8 sps:$4 sm:$0xff]  }
  0xa9   :  { %775 = vmatprep.subr.bf16.mxu0 %v3692_v0  ;;  %v3752_v0 = vld [vmem:[#allocation2 + $0x2c4] ss:$8 sps:$4 sm:$0xff]  }
  0xac   :  { %776 = vmatpush1.bf16.msra.mxu0 %v3690_v3  ;;  %v3753_v3 = vld [vmem:[#allocation2 + $0x2d0] ss:$8 sps:$4 sm:$0xff]  }
  0xad   :  { %777 = vmatprep.subr.bf16.mxu0 %v3695_v4  ;;  %v3758_v4 = vld [vmem:[#allocation2 + $0x2e4] ss:$8 sps:$4 sm:$0xff]  }
  0xb0   :  { %778 = vmatpush1.bf16.msra.mxu0 %v3693_v7  ;;  %v3759_v7 = vld [vmem:[#allocation2 + $0x2f0] ss:$8 sps:$4 sm:$0xff]  }
  0xb1   :  { %779 = vmatprep.subr.bf16.mxu0 %v3698_v8  ;;  %v104_v8 = vld [vmem:[%s4635_s0 + $0x20] sm:$0xff] }
  0xb2   :  { %v111_v10 = vpack.c.bf16 %v104_v8, %v104_v8  ;;  %v3864_v8 = vld [vmem:[#allocation4 + $0x40] ss:$24 sps:$4 sm:$0xff]  }
  0xb4   :  { %780 = vmatpush1.bf16.msra.mxu0 %v3696_v11  ;;  %v3762_v11 = vld [vmem:[#allocation2 + $0x300] ss:$8 sps:$4 sm:$0xff]  }
  0xb5   :  { %781 = vmatprep.subr.bf16.mxu0 %v3701_v12  ;;  %v106_v12 = vld [vmem:[%s4635_s0 + $0x30] sm:$0xff] }
  0xb6   :  { %v113_v13 = vpack.c.bf16 %v106_v12, %v106_v12  ;;  %v3870_v12 = vld [vmem:[#allocation4 + $0xa0] ss:$24 sps:$4 sm:$0xff]  }
  0xb8   :  { %782 = vmatpush1.bf16.msra.mxu0 %v3699_v15  ;;  %v3809_v15 = vld [vmem:[#allocation4 + $0x2a0] ss:$24 sps:$4 sm:$0xff]  }
  0xb9   :  { %783 = vmatprep.subr.bf16.mxu0 %v3704_v16  ;;  %1523 = vmatpush1.bf16.msra.mxu1 %v3809_v15  ;;  %v3810_v16 = vld [vmem:[#allocation4 + $0x2d4] ss:$24 sps:$4 sm:$0xff]   ;;  %v3878_v15 = vld [vmem:[#allocation4 + $0x104] ss:$24 sps:$4 sm:$0xff]  }
  0xba   :  { %1524 = vmatprep.subr.bf16.mxu1 %v3810_v16  ;;  %v3876_v16 = vld [vmem:[#allocation4 + $0x100] ss:$24 sps:$4 sm:$0xff]  }
  0xbc   :  { %784 = vmatpush1.bf16.msra.mxu0 %v3702_v19  ;;  %v1673_v19 = vld [vmem:[%s4637_s2] sm:$0xff] }
  0xbd   :  { %785 = vmatprep.subr.bf16.mxu0 %v3707_v20  ;;  %1525 = vmatpush1.bf16.msra.mxu1 %v3812_v17  ;;  %v214_v20 = vlaneseq  ;;  %v3881_v17 = vld [vmem:[#allocation4 + $0x134] ss:$24 sps:$4 sm:$0xff]  }
  0xbe   :  { %1535 = vmatprep.subr.bf16.mxu1 %v3815_v18  ;;  %1675 = vperm.xlu0 %3617, %v1673_v19   ;;  %v3879_v18 = vld [vmem:[#allocation4 + $0x130] ss:$24 sps:$4 sm:$0xff]   ;;  %v3884_v19 = vld [vmem:[#allocation4 + $0x164] ss:$24 sps:$4 sm:$0xff]  }
  0xbf   :  { %v4465_v21 = vshrl.u32 %v214_v20, 7 }
  0xc0   :  { %786 = vmatpush1.bf16.msra.mxu0 %v3705_v23  ;;  %v212_v23 = vld [vmem:[%s4640_s5] sm:$0x3] }
  0xc1   :  { %787 = vmatprep.subr.bf16.mxu0 %v3710_v24  ;;  %v4468_v22 = vsub.s32 0, %v4465_v21  ;;  %v4474_v24 = vsub.s32 1, %v4465_v21 }
  0xc3   :  { %v217_v25 = vrot.slane %v212_v23, %v4468_v22  ;;  %v221_v26 = vrot.slane %v212_v23, %v4474_v24  ;;  %v3882_v23 = vld [vmem:[#allocation4 + $0x160] ss:$24 sps:$4 sm:$0xff]  }
  0xc4   :  { %788 = vmatpush1.bf16.msra.mxu0 %v3708_v27 }
  0xc5   :  { %789 = vmatprep.subr.bf16.mxu0 %v3713_v28 }
  0xc8   :  { %790 = vmatpush1.bf16.msra.mxu0 %v3711_v31 }
  0xc9   :  { %800 = vmatprep.subr.bf16.mxu0 %v3716_v33 }
  0xcb   :  { %792 = vmatmul.mubr.bf16.vlgmr.msra.gmra.mrb[0].mxu0 %v109_v38  ;;  %v3818_v38 = vld [vmem:[#allocation4 + $0x3c] ss:$24 sps:$4 sm:$0xff]  }
  0xcc   :  { %801 = vmatpush1.bf16.msra.mxu0 %v3714_v37  ;;  %832 = vmatprep.mubr.bf16.mxu0 %v112_v40  ;;  %v3821_v40 = vld [vmem:[#allocation4 + $0x6c] ss:$24 sps:$4 sm:$0xff]  }
  0xcd   :  { %802 = vmatprep.subr.bf16.mxu0 %v3719_v39  ;;  %v3816_v39 = vld [vmem:[#allocation4 + $0x38] ss:$24 sps:$4 sm:$0xff]  }
  0xd0   :  { %803 = vmatpush1.bf16.msra.mxu0 %v3717_v42  ;;  %v3824_v42 = vld [vmem:[#allocation4 + $0x9c] ss:$24 sps:$4 sm:$0xff]  }
  0xd1   :  { %804 = vmatprep.subr.bf16.mxu0 %v3722_v44  ;;  %v3822_v44 = vld [vmem:[#allocation4 + $0x98] ss:$24 sps:$4 sm:$0xff]  }
  0xd4   :  { %805 = vmatpush1.bf16.msra.mxu0 %v3720_v45  ;;  %v3827_v45 = vld [vmem:[#allocation4 + $0xcc] ss:$24 sps:$4 sm:$0xff]  }
  0xd5   :  { %806 = vmatprep.subr.bf16.mxu0 %v3725_v46  ;;  %v3825_v46 = vld [vmem:[#allocation4 + $0xc8] ss:$24 sps:$4 sm:$0xff]  }
  0xd8   :  { %807 = vmatpush1.bf16.msra.mxu0 %v3723_v47  ;;  %v3830_v47 = vld [vmem:[#allocation4 + $0xfc] ss:$24 sps:$4 sm:$0xff]  }
  0xd9   :  { %808 = vmatprep.subr.bf16.mxu0 %v3728_v48  ;;  %v3828_v48 = vld [vmem:[#allocation4 + $0xf8] ss:$24 sps:$4 sm:$0xff]  }
  0xdc   :  { %809 = vmatpush1.bf16.msra.mxu0 %v3726_v49  ;;  %v3833_v49 = vld [vmem:[#allocation4 + $0x12c] ss:$24 sps:$4 sm:$0xff]  }
  0xdd   :  { %810 = vmatprep.subr.bf16.mxu0 %v3731_v50  ;;  %v3831_v50 = vld [vmem:[#allocation4 + $0x128] ss:$24 sps:$4 sm:$0xff]  }
  0xe0   :  { %811 = vmatpush1.bf16.msra.mxu0 %v3729_v51  ;;  %v3836_v51 = vld [vmem:[#allocation4 + $0x15c] ss:$24 sps:$4 sm:$0xff]  }
  0xe1   :  { %812 = vmatprep.subr.bf16.mxu0 %v3734_v52  ;;  %v3834_v52 = vld [vmem:[#allocation4 + $0x158] ss:$24 sps:$4 sm:$0xff]  }
  0xe4   :  { %813 = vmatpush1.bf16.msra.mxu0 %v3732_v53  ;;  %v3839_v53 = vld [vmem:[#allocation4 + $0x18c] ss:$24 sps:$4 sm:$0xff]  }
  0xe5   :  { %814 = vmatprep.subr.bf16.mxu0 %v3737_v54  ;;  %v3837_v54 = vld [vmem:[#allocation4 + $0x188] ss:$24 sps:$4 sm:$0xff]  }
  0xe8   :  { %815 = vmatpush1.bf16.msra.mxu0 %v3735_v55  ;;  %v3842_v55 = vld [vmem:[#allocation4 + $0x1bc] ss:$24 sps:$4 sm:$0xff]  }
  0xe9   :  { %816 = vmatprep.subr.bf16.mxu0 %v3740_v56  ;;  %v3840_v56 = vld [vmem:[#allocation4 + $0x1b8] ss:$24 sps:$4 sm:$0xff]  }
  0xec   :  { %817 = vmatpush1.bf16.msra.mxu0 %v3738_v57  ;;  %v3845_v57 = vld [vmem:[#allocation4 + $0x1ec] ss:$24 sps:$4 sm:$0xff]  }
  0xed   :  { %818 = vmatprep.subr.bf16.mxu0 %v3743_v58  ;;  %v3843_v58 = vld [vmem:[#allocation4 + $0x1e8] ss:$24 sps:$4 sm:$0xff]  }
  0xf0   :  { %819 = vmatpush1.bf16.msra.mxu0 %v3741_v59  ;;  %v3848_v59 = vld [vmem:[#allocation4 + $0x21c] ss:$24 sps:$4 sm:$0xff]  }
  0xf1   :  { %820 = vmatprep.subr.bf16.mxu0 %v3746_v60  ;;  %v3846_v60 = vld [vmem:[#allocation4 + $0x218] ss:$24 sps:$4 sm:$0xff]  }
  0xf4   :  { %821 = vmatpush1.bf16.msra.mxu0 %v3744_v61  ;;  %v3851_v61 = vld [vmem:[#allocation4 + $0x24c] ss:$24 sps:$4 sm:$0xff]  }
  0xf5   :  { %822 = vmatprep.subr.bf16.mxu0 %v3749_v62  ;;  %v3849_v62 = vld [vmem:[#allocation4 + $0x248] ss:$24 sps:$4 sm:$0xff]  }
  0xf8   :  { %823 = vmatpush1.bf16.msra.mxu0 %v3747_v63  ;;  %v3854_v63 = vld [vmem:[#allocation4 + $0x27c] ss:$24 sps:$4 sm:$0xff]  }
  0xf9   :  { %824 = vmatprep.subr.bf16.mxu0 %v3752_v0  ;;  %v3852_v0 = vld [vmem:[#allocation4 + $0x278] ss:$24 sps:$4 sm:$0xff]  }
  0xfc   :  { %825 = vmatpush1.bf16.msra.mxu0 %v3750_v1  ;;  %v3857_v1 = vld [vmem:[#allocation4 + $0x2ac] ss:$24 sps:$4 sm:$0xff]  }
  0xfd   :  { %826 = vmatprep.subr.bf16.mxu0 %v3755_v2  ;;  %v3855_v2 = vld [vmem:[#allocation4 + $0x2a8] ss:$24 sps:$4 sm:$0xff]  }
 0x100   :  { %827 = vmatpush1.bf16.msra.mxu0 %v3753_v3  ;;  %v3860_v3 = vld [vmem:[#allocation4 + $0x2dc] ss:$24 sps:$4 sm:$0xff]  }
 0x101   :  { %828 = vmatprep.subr.bf16.mxu0 %v3758_v4  ;;  %v3858_v4 = vld [vmem:[#allocation4 + $0x2d8] ss:$24 sps:$4 sm:$0xff]  }
 0x104   :  { %829 = vmatpush1.bf16.msra.mxu0 %v3756_v5  ;;  %v3863_v5 = vld [vmem:[#allocation4 + $0x14] ss:$24 sps:$4 sm:$0xff]  }
 0x105   :  { %830 = vmatprep.subr.bf16.mxu0 %v3761_v6  ;;  %v3861_v6 = vld [vmem:[#allocation4 + $0x10] ss:$24 sps:$4 sm:$0xff]  }
 0x108   :  { %831 = vmatpush1.bf16.msra.mxu0 %v3759_v7  ;;  %v3866_v7 = vld [vmem:[#allocation4 + $0x44] ss:$24 sps:$4 sm:$0xff]  }
 0x109   :  { %841 = vmatprep.subr.bf16.mxu0 %v3764_v9  ;;  %v3869_v9 = vld [vmem:[#allocation4 + $0x74] ss:$24 sps:$4 sm:$0xff]  }
 0x10b   :  { %833 = vmatmul.mubr.bf16.vlgmr.msra.gmra.mrb[0].mxu0 %v111_v10  ;;  %v3867_v10 = vld [vmem:[#allocation4 + $0x70] ss:$24 sps:$4 sm:$0xff]  }
 0x10c   :  { %842 = vmatpush1.bf16.msra.mxu0 %v3762_v11  ;;  %873 = vmatprep.mubr.bf16.mxu0 %v4303_v43  ;;  %v3872_v11 = vld [vmem:[#allocation4 + $0xa4] ss:$24 sps:$4 sm:$0xff]  }
 0x117   :  { %3284 = vmatmul.mubr.msk.bf16.vlgmr.msra.gmra.mrb[0].mxu0 %vm714_vm0, %v113_v13  ;;  %v3875_v13 = vld [vmem:[#allocation4 + $0xd4] ss:$24 sps:$4 sm:$0xff]  }
 0x1ea   :  { %v875_v27 = vpop.f32.mrb[0].mxu0 }
 0x1eb   :  { %v3583_v28 = vadd.f32 %v875_v27, %v217_v25  ;;  %v877_v29 = vpop.f32.mrb[1].mxu0  ;;  %v3887_v25 = vld [vmem:[#allocation4 + $0x194] ss:$24 sps:$4 sm:$0xff]   ;;  %v3890_v27 = vld [vmem:[#allocation4 + $0x1c4] ss:$24 sps:$4 sm:$0xff]  }
 0x1ec   :  { %v3584_v30 = vadd.f32 %v877_v29, %v221_v26  ;;  %v879_v31 = vpop.f32.mrb[2].mxu0  ;;  %v3885_v26 = vld [vmem:[#allocation4 + $0x190] ss:$24 sps:$4 sm:$0xff]   ;;  %v3893_v29 = vld [vmem:[#allocation4 + $0x1f4] ss:$24 sps:$4 sm:$0xff]  }
 0x1ed   :  { %v882_v32 = vmax.f32 %v3583_v28, 0.0  ;;  %v880_v33 = vpop.f32.mrb[3].mxu0  ;;  %v3888_v28 = vld [vmem:[#allocation4 + $0x1c0] ss:$24 sps:$4 sm:$0xff]   ;;  %v3896_v31 = vld [vmem:[#allocation4 + $0x224] ss:$24 sps:$4 sm:$0xff]  }
 0x1ee   :  { %v883_v34 = vmax.f32 %v3584_v30, 0.0  ;;  %v3891_v30 = vld [vmem:[#allocation4 + $0x1f0] ss:$24 sps:$4 sm:$0xff]   ;;  %v3899_v33 = vld [vmem:[#allocation4 + $0x254] ss:$24 sps:$4 sm:$0xff]  }
 0x1ef   :  { %v4480_v37 = vpack.c.bf16 %v882_v32, %v882_v32  ;;  %v3894_v32 = vld [vmem:[#allocation4 + $0x220] ss:$24 sps:$4 sm:$0xff]  }
 0x1f0   :  { %v4478_v35 = vpack.c.bf16 %v883_v34, %v883_v34  ;;  %v3897_v34 = vld [vmem:[#allocation4 + $0x250] ss:$24 sps:$4 sm:$0xff]  }
 0x1f2   :  { %1526 = vmatprep.mubr.bf16.mxu1 %v4478_v35 }
 0x1f3   :  { %1527 = vmatmul.mubr.bf16.vlgmr.msra.gmra.mrb[0].mxu1 %v4480_v37 }
 0x1f4   :  { %1536 = vmatpush1.bf16.msra.mxu1 %v3813_v36  ;;  %1567 = vmatprep.mubr.bf16.mxu1 %v4478_v35  ;;  %v3900_v36 = vld [vmem:[#allocation4 + $0x280] ss:$24 sps:$4 sm:$0xff]  }
 0x1f5   :  { %1537 = vmatprep.subr.bf16.mxu1 %v3818_v38  ;;  %v3905_v38 = vld [vmem:[#allocation4 + $0x2b4] ss:$24 sps:$4 sm:$0xff]  }
 0x1f8   :  { %1538 = vmatpush1.bf16.msra.mxu1 %v3816_v39  ;;  %v3903_v39 = vld [vmem:[#allocation4 + $0x2b0] ss:$24 sps:$4 sm:$0xff]  }
 0x1f9   :  { %1539 = vmatprep.subr.bf16.mxu1 %v3821_v40  ;;  %v3908_v40 = vld [vmem:[#allocation4 + $0x2e4] ss:$24 sps:$4 sm:$0xff]  }
 0x1fc   :  { %1540 = vmatpush1.bf16.msra.mxu1 %v3819_v41  ;;  %v1681_v41 = vld [vmem:[%s4638_s3 + $0x8] sm:$0xff] }
 0x1fd   :  { %1541 = vmatprep.subr.bf16.mxu1 %v3824_v42  ;;  %v1684_v42 = vld [vmem:[%s4638_s3 + $0x20] sm:$0xff] }
 0x200   :  { %1542 = vmatpush1.bf16.msra.mxu1 %v3822_v44  ;;  %v3906_v44 = vld [vmem:[#allocation4 + $0x2e0] ss:$24 sps:$4 sm:$0xff]  }
 0x201   :  { %1543 = vmatprep.subr.bf16.mxu1 %v3827_v45  ;;  %v3576_v45 = vpack.c.bf16 %v1684_v42, %v1681_v41  ;;  %v3947_v41 = vld [vmem:[#allocation6 + $0xc4] ss:$8 sps:$4 sm:$0xff]   ;;  %v3945_v42 = vld [vmem:[#allocation6 + $0xc0] ss:$8 sps:$4 sm:$0xff]  }
 0x204   :  { %1544 = vmatpush1.bf16.msra.mxu1 %v3825_v46  ;;  %v1680_v46 = vld [vmem:[%s4638_s3] sm:$0xff] }
 0x205   :  { %1545 = vmatprep.subr.bf16.mxu1 %v3830_v47  ;;  %v1683_v47 = vld [vmem:[%s4638_s3 + $0x18] sm:$0xff] }
 0x208   :  { %1546 = vmatpush1.bf16.msra.mxu1 %v3828_v48  ;;  %v3578_v48 = vpack.c.bf16 %v1683_v47, %v1680_v46  ;;  %v3953_v46 = vld [vmem:[#allocation6 + $0xe4] ss:$8 sps:$4 sm:$0xff]   ;;  %v3951_v47 = vld [vmem:[#allocation6 + $0xe0] ss:$8 sps:$4 sm:$0xff]  }
 0x209   :  { %1547 = vmatprep.subr.bf16.mxu1 %v3833_v49  ;;  %v1672_v49 = vand.u32 127, %v214_v20  ;;  %v3909_v20 = vld [vmem:[#allocation6] ss:$8 sps:$4 sm:$0xff]  }
 0x20c   :  { %1548 = vmatpush1.bf16.msra.mxu1 %v3831_v50  ;;  %v1676_v50 = vpop.permute.xlu0 %1675 }
 0x20d   :  { %1549 = vmatprep.subr.bf16.mxu1 %v3836_v51  ;;  %v4304_v51 = vmov 0.0   ;;  %vm1677_vm1 = vcmp.eq.s32.totalorder %v1676_v50, %v1672_v49  ;;  %v3954_v49 = vld [vmem:[#allocation6 + $0xf0] ss:$8 sps:$4 sm:$0xff]   ;;  %v3959_v50 = vld [vmem:[#allocation6 + $0x104] ss:$8 sps:$4 sm:$0xff]  }
 0x210   :  { %1550 = vmatpush1.bf16.msra.mxu1 %v3834_v52  ;;  %v4305_v52 = vmov 0.0|0.0  }
 0x211   :  { %1551 = vmatprep.subr.bf16.mxu1 %v3839_v53  ;;  %v1682_v53 = vld [vmem:[%s4638_s3 + $0x10] sm:$0xff] }
 0x214   :  { %1552 = vmatpush1.bf16.msra.mxu1 %v3837_v54  ;;  %v1685_v54 = vld [vmem:[%s4638_s3 + $0x28] sm:$0xff] }
 0x215   :  { %1553 = vmatprep.subr.bf16.mxu1 %v3842_v55  ;;  %v3381_v55 = vsel %vm1677_vm1, 1.0, %v4304_v51 }
 0x218   :  { %1554 = vmatpush1.bf16.msra.mxu1 %v3840_v56  ;;  %v3581_v56 = vpack.c.bf16 %v1685_v54, %v1682_v53 }
 0x219   :  { %1555 = vmatprep.subr.bf16.mxu1 %v3845_v57  ;;  %v3914_v57 = vld [vmem:[#allocation6 + $0x14] ss:$8 sps:$4 sm:$0xff]  }
 0x21c   :  { %1556 = vmatpush1.bf16.msra.mxu1 %v3843_v58  ;;  %v3912_v58 = vld [vmem:[#allocation6 + $0x10] ss:$8 sps:$4 sm:$0xff]  }
 0x21d   :  { %1557 = vmatprep.subr.bf16.mxu1 %v3848_v59  ;;  %v4512_v59 = vld [vmem:[%s4642_s7] sm:$0x3f] }
 0x220   :  { %1558 = vmatpush1.bf16.msra.mxu1 %v3846_v60  ;;  %v987_v60 = vrot.slane %v4512_v59, %v4468_v22 }
 0x221   :  { %1559 = vmatprep.subr.bf16.mxu1 %v3851_v61  ;;  %v991_v61 = vrot.slane %v4512_v59, %v4474_v24 }
 0x224   :  { %1560 = vmatpush1.bf16.msra.mxu1 %v3849_v62  ;;  %v3917_v62 = vld [vmem:[#allocation6 + $0x24] ss:$8 sps:$4 sm:$0xff]  }
 0x225   :  { %1561 = vmatprep.subr.bf16.mxu1 %v3854_v63  ;;  %v3915_v63 = vld [vmem:[#allocation6 + $0x20] ss:$8 sps:$4 sm:$0xff]  }
 0x228   :  { %1562 = vmatpush1.bf16.msra.mxu1 %v3852_v0 }
 0x229   :  { %1563 = vmatprep.subr.bf16.mxu1 %v3857_v1 }
 0x22c   :  { %1564 = vmatpush1.bf16.msra.mxu1 %v3855_v2 }
 0x22d   :  { %1565 = vmatprep.subr.bf16.mxu1 %v3860_v3 }
 0x230   :  { %1566 = vmatpush1.bf16.msra.mxu1 %v3858_v4 }
 0x231   :  { %1576 = vmatprep.subr.bf16.mxu1 %v3863_v5  ;;  %v3920_v5 = vld [vmem:[#allocation6 + $0x34] ss:$8 sps:$4 sm:$0xff]  }
 0x233   :  { %1568 = vmatmul.mubr.bf16.vlgmr.msra.gmra.mrb[4].mxu1 %v4480_v37 }
 0x234   :  { %1577 = vmatpush1.bf16.msra.mxu1 %v3861_v6  ;;  %1608 = vmatprep.mubr.bf16.mxu1 %v4478_v35  ;;  %v3902_v35 = vld [vmem:[#allocation4 + $0x284] ss:$24 sps:$4 sm:$0xff]  }
 0x235   :  { %1578 = vmatprep.subr.bf16.mxu1 %v3866_v7 }
 0x238   :  { %1579 = vmatpush1.bf16.msra.mxu1 %v3864_v8  ;;  %v3918_v8 = vld [vmem:[#allocation6 + $0x30] ss:$8 sps:$4 sm:$0xff]  }
 0x239   :  { %1580 = vmatprep.subr.bf16.mxu1 %v3869_v9 }
 0x23c   :  { %1581 = vmatpush1.bf16.msra.mxu1 %v3867_v10 }
 0x23d   :  { %1582 = vmatprep.subr.bf16.mxu1 %v3872_v11 }
 0x240   :  { %1583 = vmatpush1.bf16.msra.mxu1 %v3870_v12  ;;  %v3923_v12 = vld [vmem:[#allocation6 + $0x44] ss:$8 sps:$4 sm:$0xff]  }
 0x241   :  { %1584 = vmatprep.subr.bf16.mxu1 %v3875_v13 }
 0x244   :  { %1585 = vmatpush1.bf16.msra.mxu1 %v3873_v14  ;;  %v3921_v14 = vld [vmem:[#allocation6 + $0x40] ss:$8 sps:$4 sm:$0xff]  }
 0x245   :  { %1586 = vmatprep.subr.bf16.mxu1 %v3878_v15 }
 0x248   :  { %1587 = vmatpush1.bf16.msra.mxu1 %v3876_v16  ;;  %v3926_v16 = vld [vmem:[#allocation6 + $0x54] ss:$8 sps:$4 sm:$0xff]  }
 0x249   :  { %1588 = vmatprep.subr.bf16.mxu1 %v3881_v17  ;;  %v3924_v17 = vld [vmem:[#allocation6 + $0x50] ss:$8 sps:$4 sm:$0xff]  }
 0x24c   :  { %1589 = vmatpush1.bf16.msra.mxu1 %v3879_v18  ;;  %v3929_v18 = vld [vmem:[#allocation6 + $0x64] ss:$8 sps:$4 sm:$0xff]  }
 0x24d   :  { %1590 = vmatprep.subr.bf16.mxu1 %v3884_v19  ;;  %v3927_v19 = vld [vmem:[#allocation6 + $0x60] ss:$8 sps:$4 sm:$0xff]  }
 0x250   :  { %1591 = vmatpush1.bf16.msra.mxu1 %v3882_v23  ;;  %v3932_v23 = vld [vmem:[#allocation6 + $0x74] ss:$8 sps:$4 sm:$0xff]  }
 0x251   :  { %1592 = vmatprep.subr.bf16.mxu1 %v3887_v25 }
 0x254   :  { %1593 = vmatpush1.bf16.msra.mxu1 %v3885_v26  ;;  %v3930_v26 = vld [vmem:[#allocation6 + $0x70] ss:$8 sps:$4 sm:$0xff]  }
 0x255   :  { %1594 = vmatprep.subr.bf16.mxu1 %v3890_v27 }
 0x258   :  { %1595 = vmatpush1.bf16.msra.mxu1 %v3888_v28 }
 0x259   :  { %1596 = vmatprep.subr.bf16.mxu1 %v3893_v29 }
 0x25c   :  { %1597 = vmatpush1.bf16.msra.mxu1 %v3891_v30  ;;  %v3935_v30 = vld [vmem:[#allocation6 + $0x84] ss:$8 sps:$4 sm:$0xff]  }
 0x25d   :  { %1598 = vmatprep.subr.bf16.mxu1 %v3896_v31  ;;  %v3933_v31 = vld [vmem:[#allocation6 + $0x80] ss:$8 sps:$4 sm:$0xff]  }
 0x260   :  { %1599 = vmatpush1.bf16.msra.mxu1 %v3894_v32  ;;  %v3938_v32 = vld [vmem:[#allocation6 + $0x94] ss:$8 sps:$4 sm:$0xff]  }
 0x261   :  { %1600 = vmatprep.subr.bf16.mxu1 %v3899_v33  ;;  %v3936_v33 = vld [vmem:[#allocation6 + $0x90] ss:$8 sps:$4 sm:$0xff]  }
 0x264   :  { %1601 = vmatpush1.bf16.msra.mxu1 %v3897_v34  ;;  %v3941_v34 = vld [vmem:[#allocation6 + $0xa4] ss:$8 sps:$4 sm:$0xff]  }
 0x265   :  { %1602 = vmatprep.subr.bf16.mxu1 %v3902_v35  ;;  %v3939_v35 = vld [vmem:[#allocation6 + $0xa0] ss:$8 sps:$4 sm:$0xff]  }
 0x268   :  { %1603 = vmatpush1.bf16.msra.mxu1 %v3900_v36 }
 0x269   :  { %1604 = vmatprep.subr.bf16.mxu1 %v3905_v38 }
 0x26c   :  { %1605 = vmatpush1.bf16.msra.mxu1 %v3903_v39  ;;  %v3942_v39 = vld [vmem:[#allocation6 + $0xb0] ss:$8 sps:$4 sm:$0xff]  }
 0x26d   :  { %1606 = vmatprep.subr.bf16.mxu1 %v3908_v40  ;;  %v3944_v40 = vld [vmem:[#allocation6 + $0xb4] ss:$8 sps:$4 sm:$0xff]  }
 0x270   :  { %1607 = vmatpush1.bf16.msra.mxu1 %v3906_v44  ;;  %v3950_v44 = vld [vmem:[#allocation6 + $0xd4] ss:$8 sps:$4 sm:$0xff]  }
 0x271   :  { %3577 = vmatprep.subr.bf16.mxu1 %v3576_v45  ;;  %v3948_v45 = vld [vmem:[#allocation6 + $0xd0] ss:$8 sps:$4 sm:$0xff]  }
 0x273   :  { %1609 = vmatmul.mubr.bf16.vlgmr.msra.gmra.mrb[8].mxu1 %v4480_v37  ;;  %v3911_v37 = vld [vmem:[#allocation6 + $0x4] ss:$8 sps:$4 sm:$0xff]  }
 0x274   :  { %3579 = vmatpush1.bf16.msra.mxu1 %v3578_v48  ;;  %1753 = vmatprep.mubr.f32.mxu1 %v4304_v51  ;;  %v3956_v48 = vld [vmem:[#allocation6 + $0xf4] ss:$8 sps:$4 sm:$0xff]  }
 0x275   :  { %3580 = vmatprep.subr.bf16.mxu1 %v4305_v52  ;;  %2133 = vmatprep.subr.bf16.mxu0 %v3911_v37  ;;  %v998_v52 = vsub.s32 3, %v4465_v21 }
 0x276   :  { %2134 = vmatpush1.bf16.msra.mxu0 %v3909_v20 }
 0x277   :  { %2135 = vmatprep.subr.bf16.mxu0 %v3914_v57  ;;  %v999_v54 = vrot.slane %v4512_v59, %v998_v52 }
 0x27a   :  { %2136 = vmatpush1.bf16.msra.mxu0 %v3912_v58 }
 0x27b   :  { %3382 = vmatmul.mubr.msk.f32.vlgmr.msra.gmra.mrb[12].mxu1 %vm714_vm0, %v3381_v55  ;;  %2137 = vmatprep.subr.bf16.mxu0 %v3917_v62 }
 0x27c   :  { %3582 = vmatpush3.bf16.msra.mxu1 %v3581_v56  ;;  %3573 = vmatprep.mubr.msk.f32.mxu1 %vm4306_vm2, %v4304_v51  ;;  %v994_v51 = vsub.s32 2, %v4465_v21 }
 0x27e   :  { %2138 = vmatpush1.bf16.msra.mxu0 %v3915_v63  ;;  %v995_v53 = vrot.slane %v4512_v59, %v994_v51 }
 0x27f   :  { %3574 = vmatmul.mubr.msk.f32.vlgmr.msra.gmra.mrb[14].mxu1 %vm714_vm0, %v3381_v55  ;;  %2139 = vmatprep.subr.bf16.mxu0 %v3920_v5 }
 0x282   :  { %2140 = vmatpush1.bf16.msra.mxu0 %v3918_v8  ;;  %v3989_v8 = vld [vmem:[#allocation7 + $0x3c] ss:$28 sps:$4 sm:$0xff]  }
 0x283   :  { %2141 = vmatprep.subr.bf16.mxu0 %v3923_v12  ;;  %v3993_v12 = vld [vmem:[#allocation7 + $0x70] ss:$28 sps:$4 sm:$0xff]  }
 0x286   :  { %2142 = vmatpush1.bf16.msra.mxu0 %v3921_v14  ;;  %v4001_v14 = vld [vmem:[#allocation7 + $0xac] ss:$28 sps:$4 sm:$0xff]  }
 0x287   :  { %2143 = vmatprep.subr.bf16.mxu0 %v3926_v16  ;;  %v4007_v16 = vld [vmem:[#allocation7 + $0xe4] ss:$28 sps:$4 sm:$0xff]  }
 0x28a   :  { %2144 = vmatpush1.bf16.msra.mxu0 %v3924_v17  ;;  %v4005_v17 = vld [vmem:[#allocation7 + $0xe0] ss:$28 sps:$4 sm:$0xff]  }
 0x28b   :  { %2145 = vmatprep.subr.bf16.mxu0 %v3929_v18  ;;  %v4013_v18 = vld [vmem:[#allocation7 + $0x11c] ss:$28 sps:$4 sm:$0xff]  }
 0x28e   :  { %2146 = vmatpush1.bf16.msra.mxu0 %v3927_v19  ;;  %v4011_v19 = vld [vmem:[#allocation7 + $0x118] ss:$28 sps:$4 sm:$0xff]  }
 0x28f   :  { %2147 = vmatprep.subr.bf16.mxu0 %v3932_v23 }
 0x292   :  { %2148 = vmatpush1.bf16.msra.mxu0 %v3930_v26  ;;  %v4017_v26 = vld [vmem:[#allocation7 + $0x150] ss:$28 sps:$4 sm:$0xff]  }
 0x293   :  { %2149 = vmatprep.subr.bf16.mxu0 %v3935_v30  ;;  %v4031_v30 = vld [vmem:[#allocation7 + $0x1c4] ss:$28 sps:$4 sm:$0xff]  }
 0x296   :  { %2150 = vmatpush1.bf16.msra.mxu0 %v3933_v31  ;;  %v4029_v31 = vld [vmem:[#allocation7 + $0x1c0] ss:$28 sps:$4 sm:$0xff]  }
 0x297   :  { %2151 = vmatprep.subr.bf16.mxu0 %v3938_v32  ;;  %v1002_v32 = vsub.s32 4, %v4465_v21 }
 0x29a   :  { %2152 = vmatpush1.bf16.msra.mxu0 %v3936_v33  ;;  %v1006_v33 = vsub.s32 5, %v4465_v21 }
 0x29b   :  { %2153 = vmatprep.subr.bf16.mxu0 %v3941_v34  ;;  %v4037_v34 = vld [vmem:[#allocation7 + $0x1fc] ss:$28 sps:$4 sm:$0xff]  }
 0x29e   :  { %2154 = vmatpush1.bf16.msra.mxu0 %v3939_v35  ;;  %v4035_v35 = vld [vmem:[#allocation7 + $0x1f8] ss:$28 sps:$4 sm:$0xff]  }
 0x29f   :  { %2155 = vmatprep.subr.bf16.mxu0 %v3944_v40  ;;  %v1007_v40 = vrot.slane %v4512_v59, %v1006_v33 }
 0x2a2   :  { %2156 = vmatpush1.bf16.msra.mxu0 %v3942_v39  ;;  %v1003_v39 = vrot.slane %v4512_v59, %v1002_v32  ;;  %v4047_v59 = vld [vmem:[#allocation7 + $0x268] ss:$28 sps:$4 sm:$0xff]  }
 0x2a3   :  { %2157 = vmatprep.subr.bf16.mxu0 %v3947_v41  ;;  %v4043_v41 = vld [vmem:[#allocation7 + $0x234] ss:$28 sps:$4 sm:$0xff]  }
 0x2a6   :  { %2158 = vmatpush1.bf16.msra.mxu0 %v3945_v42 }
 0x2a7   :  { %2159 = vmatprep.subr.bf16.mxu0 %v3950_v44 }
 0x2aa   :  { %2160 = vmatpush1.bf16.msra.mxu0 %v3948_v45  ;;  %v1653_v45 = vld [vmem:[%s4636_s1] sm:$0xff] }
 0x2ab   :  { %2161 = vmatprep.subr.bf16.mxu0 %v3953_v46  ;;  %v4041_v46 = vld [vmem:[#allocation7 + $0x230] ss:$28 sps:$4 sm:$0xff]  }
 0x2ae   :  { %2162 = vmatpush1.bf16.msra.mxu0 %v3951_v47 }
 0x2af   :  { %2163 = vmatprep.subr.bf16.mxu0 %v3956_v48 }
 0x2b2   :  { %2164 = vmatpush1.bf16.msra.mxu0 %v3954_v49 }
 0x2b3   :  { %2174 = vmatprep.subr.bf16.mxu0 %v3959_v50 }
 0x2c6   :  { %v1528_v0 = vpop.f32.mrb[0].mxu1 }
 0x2c7   :  { %v1529_v1 = vadd.f32 %v1528_v0, %v987_v60  ;;  %v1530_v2 = vpop.f32.mrb[1].mxu1 }
 0x2c8   :  { %v1531_v3 = vadd.f32 %v1530_v2, %v991_v61  ;;  %v1532_v4 = vpop.f32.mrb[2].mxu1 }
 0x2c9   :  { %v1617_v6 = vmax.f32 %v1529_v1, 0.0  ;;  %v1533_v7 = vpop.f32.mrb[3].mxu1 }
 0x2ca   :  { %v1618_v9 = vmax.f32 %v1531_v3, 0.0  ;;  %v3983_v7 = vld [vmem:[#allocation7 + $0x4] ss:$28 sps:$4 sm:$0xff]  }
 0x2cb   :  { %v1623_v10 = vsub.f32 0.0, %v1617_v6  ;;  %v3981_v6 = vld [vmem:[#allocation7] ss:$28 sps:$4 sm:$0xff]   ;;  %2960 = vmatprep.subr.bf16.mxu1 %v3983_v7 }
 0x2cc   :  { %v1624_v11 = vsub.f32 0.0, %v1618_v9  ;;  %2961 = vmatpush1.bf16.msra.mxu1 %v3981_v6  ;;  %v3987_v9 = vld [vmem:[#allocation7 + $0x38] ss:$28 sps:$4 sm:$0xff]  }
 0x2cd   :  { %v1629_v13 = vmul.f32 1.442695, %v1623_v10  ;;  %2962 = vmatprep.subr.bf16.mxu1 %v3989_v8  ;;  %v3995_v10 = vld [vmem:[#allocation7 + $0x74] ss:$28 sps:$4 sm:$0xff]  }
 0x2ce   :  { %v1631_v15 = vmul.f32 1.442695, %v1624_v11 }
 0x2cf   :  { %4141 = vpow2.f32 %v1629_v13 }
 0x2d0   :  { %4143 = vpow2.f32 %v1631_v15  ;;  %2963 = vmatpush1.bf16.msra.mxu1 %v3987_v9  ;;  %v3999_v15 = vld [vmem:[#allocation7 + $0xa8] ss:$28 sps:$4 sm:$0xff]  }
 0x2d1   :  { %2964 = vmatprep.subr.bf16.mxu1 %v3995_v10 }
 0x2d4   :  { %2965 = vmatpush1.bf16.msra.mxu1 %v3993_v12 }
 0x2d5   :  { %2966 = vmatprep.subr.bf16.mxu1 %v4001_v14 }
 0x2d8   :  { %2967 = vmatpush1.bf16.msra.mxu1 %v3999_v15 }
 0x2d9   :  { %v4142_v25 = vpop.eup %4141  ;;  %2968 = vmatprep.subr.bf16.mxu1 %v4007_v16 }
 0x2da   :  { %v4144_v27 = vpop.eup %4143  ;;  %v1641_v28 = vadd.f32 1.0, %v4142_v25  ;;  %v4019_v25 = vld [vmem:[#allocation7 + $0x154] ss:$28 sps:$4 sm:$0xff]  }
 0x2db   :  { %v1642_v29 = vadd.f32 1.0, %v4144_v27 }
 0x2dc   :  { %4145 = vrcp.f32 %v1641_v28  ;;  %2969 = vmatpush1.bf16.msra.mxu1 %v4005_v17  ;;  %v4025_v28 = vld [vmem:[#allocation7 + $0x18c] ss:$28 sps:$4 sm:$0xff]   ;;  %v1654_v17 = vld [vmem:[%s4636_s1 + $0x8] sm:$0xff] }
 0x2dd   :  { %4147 = vrcp.f32 %v1642_v29  ;;  %2970 = vmatprep.subr.bf16.mxu1 %v4013_v18  ;;  %v4023_v29 = vld [vmem:[#allocation7 + $0x188] ss:$28 sps:$4 sm:$0xff]  }
 0x2de   :  { %v1655_v18 = vld [vmem:[%s4636_s1 + $0x10] sm:$0xff] }
 0x2e0   :  { %2971 = vmatpush1.bf16.msra.mxu1 %v4011_v19 }
 0x2e1   :  { %2972 = vmatprep.subr.bf16.mxu1 %v4019_v25 }
 0x2e4   :  { %2973 = vmatpush1.bf16.msra.mxu1 %v4017_v26 }
 0x2e5   :  { %2974 = vmatprep.subr.bf16.mxu1 %v4025_v28 }
 0x2e6   :  { %v4518_v36 = vpop.eup %4145 }
 0x2e7   :  { %v4520_v38 = vpop.eup %4147  ;;  %3165 = vst [vmem:[%s4648_s13] sm:$0xff] %v4518_v36 }
 0x2e8   :  { %3166 = vst [vmem:[%s4648_s13 + $0x8] sm:$0xff] %v4520_v38  ;;  %2975 = vmatpush1.bf16.msra.mxu1 %v4023_v29 }
 0x2e9   :  { %2976 = vmatprep.subr.bf16.mxu1 %v4031_v30 }
 0x2ec   :  { %2977 = vmatpush1.bf16.msra.mxu1 %v4029_v31 }
 0x2ed   :  { %2978 = vmatprep.subr.bf16.mxu1 %v4037_v34  ;;  %v3957_v34 = vld [vmem:[#allocation6 + $0x100] ss:$8 sps:$4 sm:$0xff]  }
 0x2f0   :  { %2979 = vmatpush1.bf16.msra.mxu1 %v4035_v35 }
 0x2f1   :  { %2980 = vmatprep.subr.bf16.mxu1 %v4043_v41  ;;  %v3965_v41 = vld [vmem:[#allocation6 + $0x124] ss:$8 sps:$4 sm:$0xff]  }
 0x2f4   :  { %2981 = vmatpush1.bf16.msra.mxu1 %v4041_v46  ;;  %v3974_v46 = vld [vmem:[#allocation6 + $0x154] ss:$8 sps:$4 sm:$0xff]  }
 0x306   :  { %v1569_v55 = vpop.f32.mrb[4].mxu1 }
 0x307   :  { %v1570_v56 = vadd.f32 %v1569_v55, %v995_v53  ;;  %v1571_v20 = vpop.f32.mrb[5].mxu1  ;;  %v4049_v53 = vld [vmem:[#allocation7 + $0x26c] ss:$28 sps:$4 sm:$0xff]  }
 0x308   :  { %v1572_v37 = vadd.f32 %v1571_v20, %v999_v54  ;;  %v1573_v57 = vpop.f32.mrb[6].mxu1  ;;  %2982 = vmatprep.subr.bf16.mxu1 %v4049_v53  ;;  %v3986_v53 = vld [vmem:[#allocation7 + $0x14] ss:$28 sps:$4 sm:$0xff]  }
 0x309   :  { %v1619_v58 = vmax.f32 %v1570_v56, 0.0  ;;  %v1574_v60 = vpop.f32.mrb[7].mxu1  ;;  %2983 = vmatpush1.bf16.msra.mxu1 %v4047_v59  ;;  %v3998_v59 = vld [vmem:[#allocation7 + $0x84] ss:$28 sps:$4 sm:$0xff]  }
 0x30a   :  { %v1620_v61 = vmax.f32 %v1572_v37, 0.0 }
 0x30b   :  { %v1625_v62 = vsub.f32 0.0, %v1619_v58  ;;  %v4055_v58 = vld [vmem:[#allocation7 + $0x2a4] ss:$28 sps:$4 sm:$0xff]  }
 0x30c   :  { %v1626_v63 = vsub.f32 0.0, %v1620_v61  ;;  %2984 = vmatprep.subr.bf16.mxu1 %v4055_v58  ;;  %v4002_v58 = vld [vmem:[#allocation7 + $0xb8] ss:$28 sps:$4 sm:$0xff]  }
 0x30d   :  { %v1633_v0 = vmul.f32 1.442695, %v1625_v62 }
 0x30e   :  { %v1635_v1 = vmul.f32 1.442695, %v1626_v63 }
 0x30f   :  { %4149 = vpow2.f32 %v1633_v0  ;;  %v4053_v0 = vld [vmem:[#allocation7 + $0x2a0] ss:$28 sps:$4 sm:$0xff]  }
 0x310   :  { %4151 = vpow2.f32 %v1635_v1  ;;  %2985 = vmatpush1.bf16.msra.mxu1 %v4053_v0  ;;  %v4022_v0 = vld [vmem:[#allocation7 + $0x164] ss:$28 sps:$4 sm:$0xff]  }
 0x319   :  { %v4150_v2 = vpop.eup %4149 }
 0x31a   :  { %v4152_v3 = vpop.eup %4151  ;;  %v1643_v4 = vadd.f32 1.0, %v4150_v2 }
 0x31b   :  { %v1644_v5 = vadd.f32 1.0, %v4152_v3  ;;  %v4061_v3 = vld [vmem:[#allocation7 + $0x2dc] ss:$28 sps:$4 sm:$0xff]  }
 0x31c   :  { %4153 = vrcp.f32 %v1643_v4  ;;  %2986 = vmatprep.subr.bf16.mxu1 %v4061_v3  ;;  %v4026_v3 = vld [vmem:[#allocation7 + $0x198] ss:$28 sps:$4 sm:$0xff]  }
 0x31d   :  { %4155 = vrcp.f32 %v1644_v5  ;;  %v4059_v5 = vld [vmem:[#allocation7 + $0x2d8] ss:$28 sps:$4 sm:$0xff]  }
 0x31e   :  { %2987 = vmatpush1.bf16.msra.mxu1 %v4059_v5  ;;  %v4032_v5 = vld [vmem:[#allocation7 + $0x1d0] ss:$28 sps:$4 sm:$0xff]  }
 0x326   :  { %v4538_v11 = vpop.eup %4153 }
 0x327   :  { %v4156_v13 = vpop.eup %4155  ;;  %3167 = vst [vmem:[%s4648_s13 + $0x10] sm:$0xff] %v4538_v11 }
 0x328   :  { %3168 = vst [vmem:[%s4649_s14] sm:$0xff] %v4156_v13  ;;  %v1656_v23 = vmul.f32 0.5, %v4156_v13 }
 0x32a   :  { %v1659_v27 = vmul.f32 1.442695, %v1656_v23 }
 0x32c   :  { %4157 = vpow2.f32 %v1659_v27 }
 0x336   :  { %v4158_v42 = vpop.eup %4157 }
 0x337   :  { %v1665_v56 = vmul.f32 %v4158_v42, %v1653_v45  ;;  %v3963_v42 = vld [vmem:[#allocation6 + $0x120] ss:$8 sps:$4 sm:$0xff]  }
 0x338   :  { %v3969_v45 = vld [vmem:[#allocation6 + $0x140] ss:$8 sps:$4 sm:$0xff]  }
 0x339   :  { %v1668_v61 = vadd.f32 %v4518_v36, %v1665_v56  ;;  %v3992_v56 = vld [vmem:[#allocation7 + $0x4c] ss:$28 sps:$4 sm:$0xff]  }
 0x346   :  { %v1610_v44 = vpop.f32.mrb[8].mxu1 }
 0x347   :  { %v1611_v47 = vadd.f32 %v1610_v44, %v1003_v39  ;;  %v1612_v48 = vpop.f32.mrb[9].mxu1  ;;  %v3962_v39 = vld [vmem:[#allocation6 + $0x114] ss:$8 sps:$4 sm:$0xff]   ;;  %v3971_v44 = vld [vmem:[#allocation6 + $0x144] ss:$8 sps:$4 sm:$0xff]  }
 0x348   :  { %v1613_v49 = vadd.f32 %v1612_v48, %v1007_v40  ;;  %v1614_v50 = vpop.f32.mrb[10].mxu1  ;;  %v3960_v40 = vld [vmem:[#allocation6 + $0x110] ss:$8 sps:$4 sm:$0xff]   ;;  %v3977_v48 = vld [vmem:[#allocation6 + $0x164] ss:$8 sps:$4 sm:$0xff]  }
 0x349   :  { %v1621_v54 = vmax.f32 %v1611_v47, 0.0  ;;  %v1615_v55 = vpop.f32.mrb[11].mxu1  ;;  %v3972_v47 = vld [vmem:[#allocation6 + $0x150] ss:$8 sps:$4 sm:$0xff]  }
 0x34a   :  { %v1622_v20 = vmax.f32 %v1613_v49, 0.0  ;;  %v3980_v49 = vld [vmem:[#allocation6 + $0x174] ss:$8 sps:$4 sm:$0xff]   ;;  %v3978_v50 = vld [vmem:[#allocation6 + $0x170] ss:$8 sps:$4 sm:$0xff]  }
 0x34b   :  { %v1627_v37 = vsub.f32 0.0, %v1621_v54  ;;  %v3984_v54 = vld [vmem:[#allocation7 + $0x10] ss:$28 sps:$4 sm:$0xff]  }
 0x34c   :  { %v1628_v57 = vsub.f32 0.0, %v1622_v20  ;;  %v3990_v20 = vld [vmem:[#allocation7 + $0x48] ss:$28 sps:$4 sm:$0xff]  }
 0x34d   :  { %v1637_v60 = vmul.f32 1.442695, %v1627_v37  ;;  %v3996_v37 = vld [vmem:[#allocation7 + $0x80] ss:$28 sps:$4 sm:$0xff]  }
 0x34e   :  { %v1639_v62 = vmul.f32 1.442695, %v1628_v57  ;;  %v1755_v63 = vpop.f32.mrb[12].mxu1  ;;  %v4004_v57 = vld [vmem:[#allocation7 + $0xbc] ss:$28 sps:$4 sm:$0xff]  }
 0x34f   :  { %4159 = vpow2.f32 %v1637_v60  ;;  %v1756_v1 = vadd.f32 %v1755_v63, %v1668_v61  ;;  %v1757_v2 = vpop.f32.mrb[13].mxu1  ;;  %v4010_v60 = vld [vmem:[#allocation7 + $0xf4] ss:$28 sps:$4 sm:$0xff]   ;;  %v4014_v63 = vld [vmem:[#allocation7 + $0x128] ss:$28 sps:$4 sm:$0xff]  }
 0x350   :  { %4161 = vpow2.f32 %v1639_v62  ;;  %v4008_v61 = vld [vmem:[#allocation7 + $0xf0] ss:$28 sps:$4 sm:$0xff]  }
 0x351   :  { %v1830_v35 = vpack.c.bf16 %v1756_v1, %v1756_v1  ;;  %v4016_v62 = vld [vmem:[#allocation7 + $0x12c] ss:$28 sps:$4 sm:$0xff]   ;;  %v4020_v1 = vld [vmem:[#allocation7 + $0x160] ss:$28 sps:$4 sm:$0xff]  }
 0x352   :  { %v1826_v4 = vpop.f32.mrb[14].mxu1 }
 0x353   :  { %v3575_v6 = vpop.f32.mrb[15].mxu1 }
 0x354   :  { %v4040_v6 = vld [vmem:[#allocation7 + $0x20c] ss:$28 sps:$4 sm:$0xff]  }
 0x359   :  { %v4160_v7 = vpop.eup %4159 }
 0x35a   :  { %v4162_v8 = vpop.eup %4161  ;;  %v1645_v9 = vadd.f32 1.0, %v4160_v7  ;;  %v4038_v7 = vld [vmem:[#allocation7 + $0x208] ss:$28 sps:$4 sm:$0xff]  }
 0x35b   :  { %v1646_v36 = vadd.f32 1.0, %v4162_v8  ;;  %v4046_v8 = vld [vmem:[#allocation7 + $0x244] ss:$28 sps:$4 sm:$0xff]  }
 0x35c   :  { %4163 = vrcp.f32 %v1645_v9  ;;  %v4044_v9 = vld [vmem:[#allocation7 + $0x240] ss:$28 sps:$4 sm:$0xff]  }
 0x35d   :  { %4165 = vrcp.f32 %v1646_v36  ;;  %v4052_v36 = vld [vmem:[#allocation7 + $0x27c] ss:$28 sps:$4 sm:$0xff]  }
 0x366   :  { %v4164_v10 = vpop.eup %4163 }
 0x367   :  { %v4166_v12 = vpop.eup %4165  ;;  %3169 = vst [vmem:[%s4649_s14 + $0x8] sm:$0xff] %v4164_v10  ;;  %v1657_v13 = vmul.f32 0.5, %v4164_v10  ;;  %v4050_v10 = vld [vmem:[#allocation7 + $0x278] ss:$28 sps:$4 sm:$0xff]  }
 0x368   :  { %3170 = vst [vmem:[%s4649_s14 + $0x10] sm:$0xff] %v4166_v12  ;;  %v1658_v14 = vmul.f32 0.5, %v4166_v12  ;;  %v4058_v12 = vld [vmem:[#allocation7 + $0x2b4] ss:$28 sps:$4 sm:$0xff]  }
 0x369   :  { %v1661_v15 = vmul.f32 1.442695, %v1657_v13  ;;  %v4056_v13 = vld [vmem:[#allocation7 + $0x2b0] ss:$28 sps:$4 sm:$0xff]  }
 0x36a   :  { %v1663_v16 = vmul.f32 1.442695, %v1658_v14  ;;  %v4064_v14 = vld [vmem:[#allocation7 + $0x2ec] ss:$28 sps:$4 sm:$0xff]  }
 0x36b   :  { %4167 = vpow2.f32 %v1661_v15  ;;  %v4062_v15 = vld [vmem:[#allocation7 + $0x2e8] ss:$28 sps:$4 sm:$0xff]  }
 0x36c   :  { %4169 = vpow2.f32 %v1663_v16  ;;  %v4067_v16 = vld [vmem:[#allocation7 + $0x314] ss:$28 sps:$4 sm:$0xff]  }
 0x36d   :  { %2988 = vmatprep.subr.bf16.mxu1 %v4067_v16  ;;  %v4129_v16 = vld [vmem:[#allocation7 + $0x248] ss:$28 sps:$4 sm:$0xff]  }
 0x375   :  { %v4168_v19 = vpop.eup %4167 }
 0x376   :  { %v4170_v23 = vpop.eup %4169  ;;  %v1666_v25 = vmul.f32 %v4168_v19, %v1654_v17  ;;  %v4065_v17 = vld [vmem:[#allocation7 + $0x310] ss:$28 sps:$4 sm:$0xff]   ;;  %v4068_v19 = vld [vmem:[#allocation7 + $0x320] ss:$28 sps:$4 sm:$0xff]  }
 0x377   :  { %v1667_v26 = vmul.f32 %v4170_v23, %v1655_v18  ;;  %v4070_v18 = vld [vmem:[#allocation7 + $0x324] ss:$28 sps:$4 sm:$0xff]   ;;  %2989 = vmatpush1.bf16.msra.mxu1 %v4065_v17  ;;  %v4073_v23 = vld [vmem:[#allocation7 + $0x34c] ss:$28 sps:$4 sm:$0xff]  }
 0x378   :  { %v1669_v27 = vadd.f32 %v4520_v38, %v1666_v25  ;;  %v3968_v38 = vld [vmem:[#allocation6 + $0x134] ss:$8 sps:$4 sm:$0xff]   ;;  %v4071_v25 = vld [vmem:[#allocation7 + $0x348] ss:$28 sps:$4 sm:$0xff]   ;;  %2990 = vmatprep.subr.bf16.mxu1 %v4073_v23 }
 0x379   :  { %v1670_v28 = vadd.f32 %v4538_v11, %v1667_v26  ;;  %v3966_v11 = vld [vmem:[#allocation6 + $0x130] ss:$8 sps:$4 sm:$0xff]   ;;  %v4130_v17 = vld [vmem:[#allocation7 + $0x88] ss:$28 sps:$4 sm:$0xff]  }
 0x37a   :  { %v1758_v29 = vadd.f32 %v1757_v2, %v1669_v27  ;;  %v4028_v2 = vld [vmem:[#allocation7 + $0x19c] ss:$28 sps:$4 sm:$0xff]  }
 0x37b   :  { %v1827_v30 = vadd.f32 %v1826_v4, %v1670_v28  ;;  %v4034_v4 = vld [vmem:[#allocation7 + $0x1d4] ss:$28 sps:$4 sm:$0xff]   ;;  %v4076_v26 = vld [vmem:[#allocation7 + $0x35c] ss:$28 sps:$4 sm:$0xff]   ;;  %2991 = vmatpush1.bf16.msra.mxu1 %v4071_v25  ;;  %v4079_v28 = vld [vmem:[#allocation7 + $0xc] ss:$28 sps:$4 sm:$0xff]  }
 0x37c   :  { %v1831_v31 = vpack.c.bf16 %v1758_v29, %v1758_v29  ;;  %v4074_v27 = vld [vmem:[#allocation7 + $0x358] ss:$28 sps:$4 sm:$0xff]   ;;  %3001 = vmatprep.subr.bf16.mxu1 %v4079_v28  ;;  %v1881_v29 = vld [vmem:[%s4644_s9] sm:$0x3]  ;;  %v4137_v28 = vld [vmem:[#allocation7 + $0x328] ss:$28 sps:$4 sm:$0xff]  }
 0x37d   :  { %v1832_v55 = vpack.c.bf16 %v1827_v30, %v1827_v30  ;;  %v1886_v30 = vrot.slane %v1881_v29, %v4468_v22  ;;  %v4133_v23 = vld [vmem:[#allocation7 + $0x2b8] ss:$28 sps:$4 sm:$0xff]  }
 0x37e   :  { %2165 = vmatprep.mubr.bf16.mxu0 %v1831_v31  ;;  %v1890_v31 = vrot.slane %v1881_v29, %v4474_v24  ;;  %v4134_v25 = vld [vmem:[#allocation7 + $0xf8] ss:$28 sps:$4 sm:$0xff]   ;;  %v4138_v29 = vld [vmem:[#allocation7 + $0x168] ss:$28 sps:$4 sm:$0xff]  }
 0x37f   :  { %2166 = vmatmul.mubr.bf16.vlgmr.msra.gmra.mrb[4].mxu0 %v1830_v35 }
 0x380   :  { %2175 = vmatpush1.bf16.msra.mxu0 %v3957_v34  ;;  %2206 = vmatprep.mubr.bf16.mxu0 %v4303_v43  ;;  %v3975_v43 = vld [vmem:[#allocation6 + $0x160] ss:$8 sps:$4 sm:$0xff]  }
 0x381   :  { %2176 = vmatprep.subr.bf16.mxu0 %v3962_v39 }
 0x384   :  { %2177 = vmatpush1.bf16.msra.mxu0 %v3960_v40 }
 0x385   :  { %2178 = vmatprep.subr.bf16.mxu0 %v3965_v41 }
 0x388   :  { %2179 = vmatpush1.bf16.msra.mxu0 %v3963_v42 }
 0x389   :  { %2180 = vmatprep.subr.bf16.mxu0 %v3968_v38 }
 0x38c   :  { %2181 = vmatpush1.bf16.msra.mxu0 %v3966_v11 }
 0x38d   :  { %2182 = vmatprep.subr.bf16.mxu0 %v3971_v44 }
 0x390   :  { %2183 = vmatpush1.bf16.msra.mxu0 %v3969_v45  ;;  %v4077_v45 = vld [vmem:[#allocation7 + $0x8] ss:$28 sps:$4 sm:$0xff]  }
 0x391   :  { %2184 = vmatprep.subr.bf16.mxu0 %v3974_v46 }
 0x394   :  { %2185 = vmatpush1.bf16.msra.mxu0 %v3972_v47  ;;  %v4082_v47 = vld [vmem:[#allocation7 + $0x44] ss:$28 sps:$4 sm:$0xff]  }
 0x395   :  { %2186 = vmatprep.subr.bf16.mxu0 %v3977_v48  ;;  %v4080_v48 = vld [vmem:[#allocation7 + $0x40] ss:$28 sps:$4 sm:$0xff]  }
 0x398   :  { %2187 = vmatpush1.bf16.msra.mxu0 %v3975_v43  ;;  %v4085_v43 = vld [vmem:[#allocation7 + $0x7c] ss:$28 sps:$4 sm:$0xff]  }
 0x399   :  { %2188 = vmatprep.subr.bf16.mxu0 %v3980_v49  ;;  %v4083_v49 = vld [vmem:[#allocation7 + $0x78] ss:$28 sps:$4 sm:$0xff]  }
 0x39c   :  { %2189 = vmatpush1.bf16.msra.mxu0 %v3978_v50  ;;  %v4088_v50 = vld [vmem:[#allocation7 + $0xb4] ss:$28 sps:$4 sm:$0xff]  }
 0x39d   :  { %3042 = vmatprep.subr.bf16.mxu0 %v3986_v53  ;;  %v4086_v53 = vld [vmem:[#allocation7 + $0xb0] ss:$28 sps:$4 sm:$0xff]  }
 0x39f   :  { %2207 = vmatmul.mubr.bf16.vlgmr.msra.gmra.mrb[4].mxu0 %v1832_v55  ;;  %v4089_v55 = vld [vmem:[#allocation7 + $0xe8] ss:$28 sps:$4 sm:$0xff]  }
 0x3a0   :  { %3043 = vmatpush1.bf16.msra.mxu0 %v3984_v54  ;;  %v4091_v54 = vld [vmem:[#allocation7 + $0xec] ss:$28 sps:$4 sm:$0xff]  }
 0x3a1   :  { %3044 = vmatprep.subr.bf16.mxu0 %v3992_v56  ;;  %v4094_v56 = vld [vmem:[#allocation7 + $0x124] ss:$28 sps:$4 sm:$0xff]  }
 0x3a4   :  { %3045 = vmatpush1.bf16.msra.mxu0 %v3990_v20  ;;  %v4092_v20 = vld [vmem:[#allocation7 + $0x120] ss:$28 sps:$4 sm:$0xff]  }
 0x3a5   :  { %3046 = vmatprep.subr.bf16.mxu0 %v3998_v59  ;;  %v4097_v59 = vld [vmem:[#allocation7 + $0x15c] ss:$28 sps:$4 sm:$0xff]  }
 0x3a8   :  { %3047 = vmatpush1.bf16.msra.mxu0 %v3996_v37  ;;  %v4095_v37 = vld [vmem:[#allocation7 + $0x158] ss:$28 sps:$4 sm:$0xff]  }
 0x3a9   :  { %3048 = vmatprep.subr.bf16.mxu0 %v4004_v57  ;;  %v4100_v57 = vld [vmem:[#allocation7 + $0x194] ss:$28 sps:$4 sm:$0xff]  }
 0x3ac   :  { %3049 = vmatpush1.bf16.msra.mxu0 %v4002_v58  ;;  %v4098_v58 = vld [vmem:[#allocation7 + $0x190] ss:$28 sps:$4 sm:$0xff]  }
 0x3ad   :  { %3050 = vmatprep.subr.bf16.mxu0 %v4010_v60  ;;  %v4103_v60 = vld [vmem:[#allocation7 + $0x1cc] ss:$28 sps:$4 sm:$0xff]  }
 0x3b0   :  { %3051 = vmatpush1.bf16.msra.mxu0 %v4008_v61  ;;  %v4101_v61 = vld [vmem:[#allocation7 + $0x1c8] ss:$28 sps:$4 sm:$0xff]  }
 0x3b1   :  { %3052 = vmatprep.subr.bf16.mxu0 %v4016_v62  ;;  %v4106_v62 = vld [vmem:[#allocation7 + $0x204] ss:$28 sps:$4 sm:$0xff]  }
 0x3b4   :  { %3053 = vmatpush1.bf16.msra.mxu0 %v4014_v63  ;;  %v4104_v63 = vld [vmem:[#allocation7 + $0x200] ss:$28 sps:$4 sm:$0xff]  }
 0x3b5   :  { %3054 = vmatprep.subr.bf16.mxu0 %v4022_v0  ;;  %v4109_v0 = vld [vmem:[#allocation7 + $0x23c] ss:$28 sps:$4 sm:$0xff]  }
 0x3b8   :  { %3055 = vmatpush1.bf16.msra.mxu0 %v4020_v1  ;;  %v4107_v1 = vld [vmem:[#allocation7 + $0x238] ss:$28 sps:$4 sm:$0xff]  }
 0x3b9   :  { %3056 = vmatprep.subr.bf16.mxu0 %v4028_v2  ;;  %v4112_v2 = vld [vmem:[#allocation7 + $0x274] ss:$28 sps:$4 sm:$0xff]  }
 0x3bc   :  { %3057 = vmatpush1.bf16.msra.mxu0 %v4026_v3  ;;  %v4110_v3 = vld [vmem:[#allocation7 + $0x270] ss:$28 sps:$4 sm:$0xff]  }
 0x3bd   :  { %3058 = vmatprep.subr.bf16.mxu0 %v4034_v4  ;;  %v4115_v4 = vld [vmem:[#allocation7 + $0x2ac] ss:$28 sps:$4 sm:$0xff]  }
 0x3c0   :  { %3059 = vmatpush1.bf16.msra.mxu0 %v4032_v5  ;;  %v4113_v5 = vld [vmem:[#allocation7 + $0x2a8] ss:$28 sps:$4 sm:$0xff]  }
 0x3c1   :  { %3060 = vmatprep.subr.bf16.mxu0 %v4040_v6  ;;  %v4118_v6 = vld [vmem:[#allocation7 + $0x2e4] ss:$28 sps:$4 sm:$0xff]  }
 0x3c4   :  { %3061 = vmatpush1.bf16.msra.mxu0 %v4038_v7  ;;  %v4116_v7 = vld [vmem:[#allocation7 + $0x2e0] ss:$28 sps:$4 sm:$0xff]  }
 0x3c5   :  { %3062 = vmatprep.subr.bf16.mxu0 %v4046_v8  ;;  %v4121_v8 = vld [vmem:[#allocation7 + $0x31c] ss:$28 sps:$4 sm:$0xff]  }
 0x3c8   :  { %3063 = vmatpush1.bf16.msra.mxu0 %v4044_v9  ;;  %v4119_v9 = vld [vmem:[#allocation7 + $0x318] ss:$28 sps:$4 sm:$0xff]  }
 0x3c9   :  { %3064 = vmatprep.subr.bf16.mxu0 %v4052_v36  ;;  %v4124_v36 = vld [vmem:[#allocation7 + $0x354] ss:$28 sps:$4 sm:$0xff]  }
 0x3cc   :  { %3065 = vmatpush1.bf16.msra.mxu0 %v4050_v10  ;;  %v4122_v10 = vld [vmem:[#allocation7 + $0x350] ss:$28 sps:$4 sm:$0xff]  }
 0x3cd   :  { %3066 = vmatprep.subr.bf16.mxu0 %v4058_v12  ;;  %v4125_v12 = vld [vmem:[#allocation7 + $0x1d8] ss:$28 sps:$4 sm:$0xff]  }
 0x3d0   :  { %3067 = vmatpush1.bf16.msra.mxu0 %v4056_v13  ;;  %v4126_v13 = vld [vmem:[#allocation7 + $0x18] ss:$28 sps:$4 sm:$0xff]  }
 0x3d1   :  { %3068 = vmatprep.subr.bf16.mxu0 %v4064_v14  ;;  %v4127_v14 = vld [vmem:[#allocation7 + $0x210] ss:$28 sps:$4 sm:$0xff]  }
 0x3d4   :  { %3069 = vmatpush1.bf16.msra.mxu0 %v4062_v15  ;;  %v4128_v15 = vld [vmem:[#allocation7 + $0x50] ss:$28 sps:$4 sm:$0xff]  }
 0x3d5   :  { %3070 = vmatprep.subr.bf16.mxu0 %v4070_v18  ;;  %v4131_v18 = vld [vmem:[#allocation7 + $0x280] ss:$28 sps:$4 sm:$0xff]  }
 0x3d8   :  { %3071 = vmatpush1.bf16.msra.mxu0 %v4068_v19  ;;  %v4132_v19 = vld [vmem:[#allocation7 + $0xc0] ss:$28 sps:$4 sm:$0xff]  }
 0x3d9   :  { %3072 = vmatprep.subr.bf16.mxu0 %v4076_v26  ;;  %v4135_v26 = vld [vmem:[#allocation7 + $0x2f0] ss:$28 sps:$4 sm:$0xff]  }
 0x3dc   :  { %3073 = vmatpush1.bf16.msra.mxu0 %v4074_v27  ;;  %v4136_v27 = vld [vmem:[#allocation7 + $0x130] ss:$28 sps:$4 sm:$0xff]  }
 0x472   :  { %v2208_v34 = vpop.f32.mrb[4].mxu0 }
 0x473   :  { %v3585_v35 = vadd.f32 %v2208_v34, %v1886_v30  ;;  %v2210_v39 = vpop.f32.mrb[5].mxu0  ;;  %v4139_v30 = vld [vmem:[#allocation7 + $0x360] ss:$28 sps:$4 sm:$0xff]   ;;  %v4594_v34 = vld [vmem:[%s4646_s11] sm:$0xff] }
 0x474   :  { %v3586_v40 = vadd.f32 %v2210_v39, %v1890_v31  ;;  %v2212_v41 = vpop.f32.mrb[6].mxu0  ;;  %v4140_v31 = vld [vmem:[#allocation7 + $0x1a0] ss:$28 sps:$4 sm:$0xff]   ;;  %v2368_v39 = vrot.slane %v4594_v34, %v1002_v32 }
 0x475   :  { %v2215_v42 = vmax.f32 %v3585_v35, 0.0  ;;  %v2213_v38 = vpop.f32.mrb[7].mxu0  ;;  %v2352_v35 = vrot.slane %v4594_v34, %v4468_v22  ;;  %v2372_v41 = vrot.slane %v4594_v34, %v1006_v33 }
 0x476   :  { %v2216_v11 = vmax.f32 %v3586_v40, 0.0  ;;  %v2356_v40 = vrot.slane %v4594_v34, %v4474_v24 }
 0x477   :  { %v4581_v46 = vpack.c.bf16 %v2215_v42, %v2215_v42 }
 0x478   :  { %v4579_v44 = vpack.c.bf16 %v2216_v11, %v2216_v11 }
 0x47a   :  { %2992 = vmatprep.mubr.bf16.mxu1 %v4579_v44  ;;  %3074 = vmatprep.mubr.bf16.mxu0 %v4579_v44 }
 0x47b   :  { %2993 = vmatmul.mubr.bf16.vlgmr.msra.gmra.mrb[16].mxu1 %v4581_v46  ;;  %3075 = vmatmul.mubr.bf16.vlgmr.msra.gmra.mrb[8].mxu0 %v4581_v46 }
 0x47c   :  { %3002 = vmatpush1.bf16.msra.mxu1 %v4077_v45  ;;  %3033 = vmatprep.mubr.bf16.mxu1 %v4579_v44 }
 0x47d   :  { %3003 = vmatprep.subr.bf16.mxu1 %v4082_v47 }
 0x480   :  { %3004 = vmatpush1.bf16.msra.mxu1 %v4080_v48 }
 0x481   :  { %3005 = vmatprep.subr.bf16.mxu1 %v4085_v43 }
 0x484   :  { %3006 = vmatpush1.bf16.msra.mxu1 %v4083_v49 }
 0x485   :  { %3007 = vmatprep.subr.bf16.mxu1 %v4088_v50 }
 0x488   :  { %3008 = vmatpush1.bf16.msra.mxu1 %v4086_v53 }
 0x489   :  { %3009 = vmatprep.subr.bf16.mxu1 %v4091_v54 }
 0x48c   :  { %3010 = vmatpush1.bf16.msra.mxu1 %v4089_v55 }
 0x48d   :  { %3011 = vmatprep.subr.bf16.mxu1 %v4094_v56 }
 0x490   :  { %3012 = vmatpush1.bf16.msra.mxu1 %v4092_v20 }
 0x491   :  { %3013 = vmatprep.subr.bf16.mxu1 %v4097_v59 }
 0x494   :  { %3014 = vmatpush1.bf16.msra.mxu1 %v4095_v37 }
 0x495   :  { %3015 = vmatprep.subr.bf16.mxu1 %v4100_v57 }
 0x498   :  { %3016 = vmatpush1.bf16.msra.mxu1 %v4098_v58 }
 0x499   :  { %3017 = vmatprep.subr.bf16.mxu1 %v4103_v60 }
 0x49c   :  { %3018 = vmatpush1.bf16.msra.mxu1 %v4101_v61 }
 0x49d   :  { %3019 = vmatprep.subr.bf16.mxu1 %v4106_v62 }
 0x4a0   :  { %3020 = vmatpush1.bf16.msra.mxu1 %v4104_v63 }
 0x4a1   :  { %3021 = vmatprep.subr.bf16.mxu1 %v4109_v0 }
 0x4a4   :  { %3022 = vmatpush1.bf16.msra.mxu1 %v4107_v1 }
 0x4a5   :  { %3023 = vmatprep.subr.bf16.mxu1 %v4112_v2 }
 0x4a8   :  { %3024 = vmatpush1.bf16.msra.mxu1 %v4110_v3 }
 0x4a9   :  { %3025 = vmatprep.subr.bf16.mxu1 %v4115_v4  ;;  %v2360_v4 = vrot.slane %v4594_v34, %v994_v51 }
 0x4ac   :  { %3026 = vmatpush1.bf16.msra.mxu1 %v4113_v5  ;;  %v2364_v5 = vrot.slane %v4594_v34, %v998_v52  ;;  %v2375_v52 = vsub.s32 6, %v4465_v21 }
 0x4ad   :  { %3027 = vmatprep.subr.bf16.mxu1 %v4118_v6 }
 0x4b0   :  { %3028 = vmatpush1.bf16.msra.mxu1 %v4116_v7 }
 0x4b1   :  { %3029 = vmatprep.subr.bf16.mxu1 %v4121_v8 }
 0x4b4   :  { %3030 = vmatpush1.bf16.msra.mxu1 %v4119_v9 }
 0x4b5   :  { %3031 = vmatprep.subr.bf16.mxu1 %v4124_v36 }
 0x4b8   :  { %3032 = vmatpush1.bf16.msra.mxu1 %v4122_v10 }
 0x4b9   :  { %3547 = vmatprep.subr.bf16.mxu1 %v4125_v12 }
 0x4bb   :  { %3034 = vmatmul.mubr.bf16.vlgmr.msra.gmra.mrb[20].mxu1 %v4581_v46 }
 0x4bc   :  { %3548 = vmatpush3.bf16.msra.mxu1 %v4126_v13  ;;  %3115 = vmatprep.mubr.bf16.mxu1 %v4579_v44 }
 0x4bd   :  { %3549 = vmatprep.subr.bf16.mxu1 %v4127_v14 }
 0x4c0   :  { %3550 = vmatpush3.bf16.msra.mxu1 %v4128_v15 }
 0x4c1   :  { %3551 = vmatprep.subr.bf16.mxu1 %v4129_v16 }
 0x4c4   :  { %3552 = vmatpush3.bf16.msra.mxu1 %v4130_v17 }
 0x4c5   :  { %3553 = vmatprep.subr.bf16.mxu1 %v4131_v18 }
 0x4c8   :  { %3554 = vmatpush3.bf16.msra.mxu1 %v4132_v19 }
 0x4c9   :  { %3555 = vmatprep.subr.bf16.mxu1 %v4133_v23 }
 0x4cc   :  { %3556 = vmatpush3.bf16.msra.mxu1 %v4134_v25 }
 0x4cd   :  { %3557 = vmatprep.subr.bf16.mxu1 %v4135_v26  ;;  %v2376_v26 = vrot.slane %v4594_v34, %v2375_v52 }
 0x4d0   :  { %3558 = vmatpush3.bf16.msra.mxu1 %v4136_v27 }
 0x4d1   :  { %3559 = vmatprep.subr.bf16.mxu1 %v4137_v28 }
 0x4d4   :  { %3560 = vmatpush3.bf16.msra.mxu1 %v4138_v29 }
 0x4d5   :  { %3561 = vmatprep.subr.bf16.mxu1 %v4139_v30 }
 0x4d8   :  { %3562 = vmatpush3.bf16.msra.mxu1 %v4140_v31 }
 0x4db   :  { %3116 = vmatmul.mubr.bf16.vlgmr.msra.gmra.mrb[24].mxu1 %v4581_v46 }
 0x54e   :  { %v2994_v42 = vpop.f32.mrb[16].mxu1  ;;  %v3076_v38 = vpop.f32.mrb[8].mxu0 }
 0x54f   :  { %v2995_v11 = vadd.f32 %v2994_v42, %v2352_v35  ;;  %v3077_v44 = vadd.f32 %v3076_v38, %v2368_v39  ;;  %v2996_v45 = vpop.f32.mrb[17].mxu1  ;;  %v3078_v46 = vpop.f32.mrb[9].mxu0 }
 0x550   :  { %v2997_v47 = vadd.f32 %v2996_v45, %v2356_v40  ;;  %v3079_v48 = vadd.f32 %v3078_v46, %v2372_v41  ;;  %v2998_v22 = vpop.f32.mrb[18].mxu1  ;;  %v3080_v43 = vpop.f32.mrb[10].mxu0 }
 0x551   :  { %v3123_v49 = vsub.f32 0.0, %v2995_v11  ;;  %v3127_v50 = vsub.f32 0.0, %v3077_v44  ;;  %v2999_v32 = vpop.f32.mrb[19].mxu1  ;;  %v3081_v53 = vpop.f32.mrb[11].mxu0 }
 0x552   :  { %v3124_v54 = vsub.f32 0.0, %v2997_v47  ;;  %v3128_v24 = vsub.f32 0.0, %v3079_v48 }
 0x553   :  { %v3130_v55 = vmul.f32 1.442695, %v3123_v49  ;;  %v3138_v56 = vmul.f32 1.442695, %v3127_v50 }
 0x554   :  { %v3132_v20 = vmul.f32 1.442695, %v3124_v54  ;;  %v3140_v33 = vmul.f32 1.442695, %v3128_v24 }
 0x555   :  { %4171 = vpow2.f32 %v3130_v55 }
 0x556   :  { %4173 = vpow2.f32 %v3138_v56 }
 0x557   :  { %4175 = vpow2.f32 %v3132_v20 }
 0x558   :  { %4177 = vpow2.f32 %v3140_v33 }
 0x55f   :  { %v4172_v59 = vpop.eup %4171 }
 0x560   :  { %v4174_v37 = vpop.eup %4173  ;;  %v3144_v57 = vadd.f32 1.0, %v4172_v59 }
 0x561   :  { %v4176_v58 = vpop.eup %4175  ;;  %v3148_v60 = vadd.f32 1.0, %v4174_v37 }
 0x562   :  { %v4178_v61 = vpop.eup %4177  ;;  %4179 = vrcp.f32 %v3144_v57  ;;  %v3145_v62 = vadd.f32 1.0, %v4176_v58 }
 0x563   :  { %4181 = vrcp.f32 %v3148_v60  ;;  %v3149_v63 = vadd.f32 1.0, %v4178_v61 }
 0x564   :  { %4183 = vrcp.f32 %v3145_v62 }
 0x565   :  { %4185 = vrcp.f32 %v3149_v63 }
 0x56c   :  { %v4180_v0 = vpop.eup %4179 }
 0x56d   :  { %v4182_v1 = vpop.eup %4181  ;;  %3158 = vst [vmem:[%s4647_s12] sm:$0xff] %v4180_v0 }
 0x56e   :  { %v4184_v2 = vpop.eup %4183  ;;  %3162 = vst [vmem:[%s4647_s12 + $0x20] sm:$0xff] %v4182_v1 }
 0x56f   :  { %v4186_v3 = vpop.eup %4185  ;;  %3159 = vst [vmem:[%s4647_s12 + $0x8] sm:$0xff] %v4184_v2 }
 0x570   :  { %3163 = vst [vmem:[%s4647_s12 + $0x28] sm:$0xff] %v4186_v3 }
 0x58e   :  { %v3035_v6 = vpop.f32.mrb[20].mxu1 }
 0x58f   :  { %v3036_v7 = vadd.f32 %v3035_v6, %v2360_v4  ;;  %v3037_v8 = vpop.f32.mrb[21].mxu1 }
 0x590   :  { %v3038_v9 = vadd.f32 %v3037_v8, %v2364_v5  ;;  %v3039_v36 = vpop.f32.mrb[22].mxu1 }
 0x591   :  { %v3125_v10 = vsub.f32 0.0, %v3036_v7  ;;  %v3040_v12 = vpop.f32.mrb[23].mxu1 }
 0x592   :  { %v3126_v13 = vsub.f32 0.0, %v3038_v9 }
 0x593   :  { %v3134_v14 = vmul.f32 1.442695, %v3125_v10 }
 0x594   :  { %v3136_v15 = vmul.f32 1.442695, %v3126_v13 }
 0x595   :  { %4187 = vpow2.f32 %v3134_v14 }
 0x596   :  { %4189 = vpow2.f32 %v3136_v15 }
 0x59f   :  { %v4188_v16 = vpop.eup %4187 }
 0x5a0   :  { %v4190_v17 = vpop.eup %4189  ;;  %v3146_v18 = vadd.f32 1.0, %v4188_v16 }
 0x5a1   :  { %v3147_v51 = vadd.f32 1.0, %v4190_v17 }
 0x5a2   :  { %4191 = vrcp.f32 %v3146_v18 }
 0x5a3   :  { %4193 = vrcp.f32 %v3147_v51 }
 0x5ac   :  { %v4192_v19 = vpop.eup %4191 }
 0x5ad   :  { %v4194_v23 = vpop.eup %4193  ;;  %3160 = vst [vmem:[%s4647_s12 + $0x10] sm:$0xff] %v4192_v19 }
 0x5ae   :  { %3161 = vst [vmem:[%s4647_s12 + $0x18] sm:$0xff] %v4194_v23  ;;  %v3563_v25 = vpop.f32.mrb[24].mxu1 }
 0x5af   :  { %v3564_v27 = vpop.f32.mrb[25].mxu1 }
 0x5b0   :  { %v3565_v28 = vadd.f32 %v3564_v27, %v3563_v25  ;;  %v3566_v29 = vpop.f32.mrb[26].mxu1 }
 0x5b1   :  { %v3567_v30 = vpop.f32.mrb[27].mxu1 }
 0x5b2   :  { %v3118_v31 = vadd.f32 %v3565_v28, %v2376_v26 }
 0x5b4   :  { %v3129_v35 = vsub.f32 0.0, %v3118_v31 }
 0x5b6   :  { %v3142_v21 = vmul.f32 1.442695, %v3129_v35 }
 0x5b8   :  { %4195 = vpow2.f32 %v3142_v21 }
 0x5c2   :  { %v4196_v39 = vpop.eup %4195 }
 0x5c3   :  { %v3150_v40 = vadd.f32 1.0, %v4196_v39 }
 0x5c5   :  { %4197 = vrcp.f32 %v3150_v40 }
 0x5cf   :  { %v4198_v41 = vpop.eup %4197 }
 0x5d0   :  { %3164 = vst [vmem:[%s4647_s12 + $0x30] sm:$0xff] %v4198_v41 }
 0x5d1   :  { %3183 = vsyncpa [#allocation3], 1 }
 0x5d2   :  { %3184 = vsyncpa [#allocation5], 1 }
 0x5d3   :  { %3185 = vsyncpa [#allocation8], 1 }

</bundles_post_ra>
